<compile_context>
chip_gen: v7x
topology: tpu7x:2x2x1
jax: 0.10.0
libtpu: 0.0.40
codegen_flags: <defaults>
</compile_context>

<pallas_src>
import functools

import jax
import jax.numpy as jnp
from jax.experimental import pallas as pl
from jax.experimental.pallas import tpu as pltpu


def _e2e_dynamic_kernel(
    xa_ref, xt_ref,
    fc1a_ref, fc2a_ref, fcba_ref, w1_ref, b1t_ref,
    fc1b_ref, fc2b_ref, fcbb_ref, w2_ref, b2t_ref,
    pool_r_ref, pool_c_ref, bexp_ref, pw_ref, ph_ref,
    out_ref,
    *, K, out_planes, temperature):
  f32 = jnp.float32
  xa = xa_ref[0]                    # (C*d, TB*d)  rows (c,i), cols (t,w)  [bf16]
  xt = xt_ref[0]                    # (C*d, TB*d)  rows (c,j), cols (t,h)  [bf16]

  # ---- adaptive avg-pool over the d*d spatial positions, all TB samples at
  # once, as two small matmuls (keeps everything lane-dense) ----
  xm = jnp.dot(pool_r_ref[...],
               jnp.dot(xa.astype(f32), pool_c_ref[...],
                       preferred_element_type=f32),
               preferred_element_type=f32)                          # (C, TB)

  # ---- attention2d: fc1 -> relu -> fc2(+bias) -> softmax(x/T), column-batched ----
  def attention(fc1, fc2, fcb):
    h = jnp.maximum(jnp.dot(fc1[...], xm, preferred_element_type=f32), 0.0)
    logits = jnp.dot(fc2[...], h, preferred_element_type=f32) + fcb[...]  # (K, TB)
    z = logits * (1.0 / temperature)
    z = z - jnp.max(z, axis=0, keepdims=True)
    e = jnp.exp(z)
    return e * pl.reciprocal(jnp.sum(e, axis=0, keepdims=True), approx=True)

  att1 = attention(fc1a_ref, fc2a_ref, fcba_ref)                    # (K, TB)
  att2 = attention(fc1b_ref, fc2b_ref, fcbb_ref)                    # (K, TB)

  # ---- both convs as a single lane-dense matmul per branch (all K experts),
  # bf16 inputs, f32 accumulation ----
  y1 = jnp.dot(w1_ref[...], xa, preferred_element_type=f32)         # (K*out, TB*d)
  y2 = jnp.dot(w2_ref[...], xt, preferred_element_type=f32)         # (K*out, TB*d)

  # expand per-sample attention weights to per-(sample, position) lanes
  att1e = jnp.dot(att1, bexp_ref[...], preferred_element_type=f32)  # (K, TB*d)
  att2e = jnp.dot(att2, bexp_ref[...], preferred_element_type=f32)

  # mix the K experts (valid by linearity: (sum_k a_k W_k) x == sum_k a_k (W_k x))
  a_feat = att1e[0:1, :] * y1[0:out_planes, :]                      # (out, TB*d) (o, t*d+w)
  b_feat = att2e[0:1, :] * y2[0:out_planes, :]                      # (out, TB*d) (o, t*d+h)
  for k in range(1, K):
    a_feat = a_feat + att1e[k:k + 1, :] * y1[k * out_planes:(k + 1) * out_planes, :]
    b_feat = b_feat + att2e[k:k + 1, :] * y2[k * out_planes:(k + 1) * out_planes, :]

  # ---- attention-aggregated biases, expanded to (out, TB*d) ----
  bias_t = (jnp.dot(b1t_ref[...], att1, preferred_element_type=f32) +
            jnp.dot(b2t_ref[...], att2, preferred_element_type=f32))      # (out, TB)
  bias_e = jnp.dot(bias_t, bexp_ref[...], preferred_element_type=f32)     # (out, TB*d)

  # ---- cat([a]*d, 2) + cat([b]*d, 3) via two constant 0/1 broadcast matmuls;
  # single lane-dense store of the whole (out, TB*d*d) block ----
  out_flat = (jnp.dot(a_feat + bias_e, pw_ref[...], preferred_element_type=f32) +
              jnp.dot(b_feat, ph_ref[...], preferred_element_type=f32))
  out_ref[0] = out_flat.astype(out_ref.dtype)


def e2e_dynamic_forward(A, params, *, in_channel, out_channel, d, K,
                        temperature=34.0, block_b=None,
                        compute_dtype=jnp.bfloat16):
  """Pallas implementation of E2E_dyncmic.forward (NCHW in, NCHW out)."""
  C = in_channel
  Cd = C * d
  x = A.reshape(-1, C, d, d).astype(jnp.float32)            # A.view(-1, C, d, d)
  B = x.shape[0]

  # batch tile so the matmul RHS / output stores are >=128 lanes wide
  if block_b is None:
    TB = min(max(1, -(-128 // d)), B)
  else:
    TB = min(block_b, B)
  nblk = -(-B // TB)
  Bp = nblk * TB
  if Bp != B:                                               # pad (zeros are safe)
    x = jnp.concatenate([x, jnp.zeros((Bp - B, C, d, d), x.dtype)], axis=0)
  TBd = TB * d

  # host layout glue: one activation slab per conv orientation, batch-tiled
  xa = (x.reshape(nblk, TB, C, d, d).transpose(0, 2, 3, 1, 4)
        .reshape(nblk, Cd, TBd).astype(compute_dtype))      # [blk, c*d+i, t*d+w] = x[b,c,i,w]
  xt = (x.transpose(0, 1, 3, 2).reshape(nblk, TB, C, d, d)
        .transpose(0, 2, 3, 1, 4)
        .reshape(nblk, Cd, TBd).astype(compute_dtype))      # [blk, c*d+j, t*d+h] = x[b,c,h,j]

  (fc1a, fc2a, fcba, w1, bias1, fc1b, fc2b, fcbb, w2, bias2) = params
  w1_2d = w1.reshape(K * out_channel, Cd).astype(compute_dtype)   # (K,out,C,d,1) -> (K*out, C*d)
  w2_2d = w2.reshape(K * out_channel, Cd).astype(compute_dtype)   # (K,out,C,1,d) -> (K*out, C*d)
  b1t = bias1.T.astype(jnp.float32)                               # (out, K)
  b2t = bias2.T.astype(jnp.float32)
  fcba_c = fcba.reshape(K, 1).astype(jnp.float32)
  fcbb_c = fcbb.reshape(K, 1).astype(jnp.float32)
  fc1a = fc1a.astype(jnp.float32); fc2a = fc2a.astype(jnp.float32)
  fc1b = fc1b.astype(jnp.float32); fc2b = fc2b.astype(jnp.float32)

  # constant 0/1 helper matrices (pooling, per-sample lane expansion, and the
  # final cat+cat broadcast) so everything runs as lane-dense MXU matmuls
  f32 = jnp.float32
  r_cd = jnp.arange(Cd)
  r_td = jnp.arange(TBd)
  s = jnp.arange(TBd * d)
  pool_r = ((r_cd[None, :] // d) == jnp.arange(C)[:, None]).astype(f32) / d    # (C, Cd)
  pool_c = ((r_td[:, None] // d) == jnp.arange(TB)[None, :]).astype(f32) / d   # (TBd, TB)
  bexp = ((r_td[None, :] // d) == jnp.arange(TB)[:, None]).astype(f32)         # (TB, TBd)
  same_t = (r_td[:, None] // d) == (s[None, :] // (d * d))
  pw = (same_t & ((r_td[:, None] % d) == (s[None, :] % d))).astype(f32)        # (TBd, TBd*d)
  ph = (same_t & ((r_td[:, None] % d) == ((s[None, :] // d) % d))).astype(f32) # (TBd, TBd*d)

  kernel = functools.partial(_e2e_dynamic_kernel, K=K, out_planes=out_channel,
                             temperature=float(temperature))

  per_b = lambda b: (b, 0, 0)
  full2 = lambda b: (0, 0)

  consts = (fc1a, fc2a, fcba_c, w1_2d, b1t, fc1b, fc2b, fcbb_c, w2_2d, b2t,
            pool_r, pool_c, bexp, pw, ph)
  itemsize = jnp.dtype(compute_dtype).itemsize
  est_vmem = (2 * 2 * Cd * TBd * itemsize                    # double-buffered xa/xt blocks
              + 2 * out_channel * TBd * d * 4                # double-buffered out block
              + 2 * sum(int(c.size) * jnp.dtype(c.dtype).itemsize for c in consts)
              + (4 << 20))                                   # slack for temporaries
  vmem_limit = int(min(max(2 * est_vmem, 32 << 20), 64 << 20))

  out = pl.pallas_call(
      kernel,
      out_shape=jax.ShapeDtypeStruct((nblk, out_channel, TBd * d), jnp.float32),
      grid_spec=pltpu.PrefetchScalarGridSpec(
          num_scalar_prefetch=0,
          grid=(nblk,),
          in_specs=[
              pl.BlockSpec((1, Cd, TBd), per_b),             # xa
              pl.BlockSpec((1, Cd, TBd), per_b),             # xt
              pl.BlockSpec(fc1a.shape, full2),               # fc1 (branch a)
              pl.BlockSpec(fc2a.shape, full2),               # fc2 (branch a)
              pl.BlockSpec((K, 1), full2),                   # fc2 bias (a)
              pl.BlockSpec((K * out_channel, Cd), full2),    # expert weights (a)
              pl.BlockSpec((out_channel, K), full2),         # expert bias^T (a)
              pl.BlockSpec(fc1b.shape, full2),               # fc1 (branch b)
              pl.BlockSpec(fc2b.shape, full2),               # fc2 (branch b)
              pl.BlockSpec((K, 1), full2),                   # fc2 bias (b)
              pl.BlockSpec((K * out_channel, Cd), full2),    # expert weights (b)
              pl.BlockSpec((out_channel, K), full2),         # expert bias^T (b)
              pl.BlockSpec((C, Cd), full2),                  # pool_r
              pl.BlockSpec((TBd, TB), full2),                # pool_c
              pl.BlockSpec((TB, TBd), full2),                # bexp
              pl.BlockSpec((TBd, TBd * d), full2),           # pw
              pl.BlockSpec((TBd, TBd * d), full2),           # ph
          ],
          out_specs=pl.BlockSpec((1, out_channel, TBd * d), per_b),
      ),
      compiler_params=pltpu.CompilerParams(
          dimension_semantics=("parallel",),
          vmem_limit_bytes=vmem_limit),
  )(xa, xt, fc1a, fc2a, fcba_c, w1_2d, b1t, fc1b, fc2b, fcbb_c, w2_2d, b2t,
    pool_r, pool_c, bexp, pw, ph)

  # (nblk, out, TB*d*d) with flat index t*d*d + h*d + w  ->  NCHW (B, out, d, d)
  out = (out.reshape(nblk, out_channel, TB, d, d)
         .transpose(0, 2, 1, 3, 4).reshape(Bp, out_channel, d, d))
  return out[:B]


def init_params(key, *, in_channel, out_channel, d, K, ratio=0.25):
  """Deterministic synthetic init mirroring the module's parameter shapes."""
  C = in_channel
  hidden = K if C == 3 else int(C * ratio) + 1
  ks = jax.random.split(key, 8)

  def kaiming_normal(k, shape, fan_out):        # kaiming_normal_, fan_out, relu
    return jax.random.normal(k, shape, jnp.float32) * jnp.sqrt(2.0 / fan_out)

  def kaiming_uniform(k, shape, fan_in):        # kaiming_uniform_ per expert
    bound = jnp.sqrt(6.0 / fan_in)
    return jax.random.uniform(k, shape, jnp.float32, -bound, bound)

  fc1a = kaiming_normal(ks[0], (hidden, C), hidden)
  fc2a = kaiming_normal(ks[1], (K, hidden), K)
  fcba = jnp.zeros((K,), jnp.float32)                         # torch: constant_(bias, 0)
  w1 = kaiming_uniform(ks[2], (K, out_channel, C, d, 1), C * d)
  # torch inits the dynamic-conv bias to zeros; use small random values so the
  # bias path is actually exercised numerically (still deterministic).
  bias1 = 0.01 * jax.random.normal(ks[3], (K, out_channel), jnp.float32)

  fc1b = kaiming_normal(ks[4], (hidden, C), hidden)
  fc2b = kaiming_normal(ks[5], (K, hidden), K)
  fcbb = jnp.zeros((K,), jnp.float32)
  w2 = kaiming_uniform(ks[6], (K, out_channel, C, 1, d), C * d)
  bias2 = 0.01 * jax.random.normal(ks[7], (K, out_channel), jnp.float32)

  return (fc1a, fc2a, fcba, w1, bias1, fc1b, fc2b, fcbb, w2, bias2)


def reference_forward(A, params, *, in_channel, out_channel, d, K,
                      temperature=34.0):
  """Pure-JAX (f32) reference matching the PyTorch forward semantics."""
  x = A.reshape(-1, in_channel, d, d).astype(jnp.float32)
  (fc1a, fc2a, fcba, w1, bias1, fc1b, fc2b, fcbb, w2, bias2) = params

  def attention(fc1, fc2, fcb):
    xm = jnp.mean(x, axis=(2, 3))                             # (B, C)
    h = jnp.maximum(xm @ fc1.T, 0.0)
    logits = h @ fc2.T + fcb[None, :]
    return jax.nn.softmax(logits / temperature, axis=1)       # (B, K)

  att1 = attention(fc1a, fc2a, fcba)
  att2 = attention(fc1b, fc2b, fcbb)
  Wb1 = jnp.einsum('bk,koci->boci', att1, w1[..., 0])         # (B,out,C,d)
  Wb2 = jnp.einsum('bk,kocj->bocj', att2, w2[:, :, :, 0, :])  # (B,out,C,d)
  bb1 = att1 @ bias1                                          # (B,out)
  bb2 = att2 @ bias2
  a = jnp.einsum('bciw,boci->bow', x, Wb1) + bb1[:, :, None]  # (B,out,d) over w
  bf = jnp.einsum('bchj,bocj->boh', x, Wb2) + bb2[:, :, None] # (B,out,d) over h
  return a[:, :, None, :] + bf[:, :, :, None]                 # (B,out,d,d)


if __name__ == "__main__":
  in_channel, out_channel, d, K, batch = 4, 8, 8, 4, 32
  key = jax.random.PRNGKey(0)
  k_a, k_p = jax.random.split(key)
  A = jax.random.normal(k_a, (batch, in_channel, d, d), jnp.float32)
  params = init_params(k_p, in_channel=in_channel, out_channel=out_channel,
                       d=d, K=K)

  fwd = jax.jit(functools.partial(
      e2e_dynamic_forward, in_channel=in_channel, out_channel=out_channel,
      d=d, K=K))
  out = jax.block_until_ready(fwd(A, params))
  assert out.shape == (batch, out_channel, d, d)

  ref = reference_forward(A, params, in_channel=in_channel,
                          out_channel=out_channel, d=d, K=K)
  # bf16 MXU inputs with f32 accumulation vs an all-f32 reference.
  if not bool(jnp.allclose(out, ref, atol=2e-2, rtol=2e-2)):
    raise AssertionError("Pallas kernel does not match JAX reference")

  print("KERNEL_OK")
</pallas_src>

<mosaic_0001>
module attributes {stable_mosaic.version = 11 : i64} {
  func.func @_e2e_dynamic_kernel(%arg0: i32, %arg1: memref<1x32x128xbf16, #tpu.memory_space<vmem>>, %arg2: memref<1x32x128xbf16, #tpu.memory_space<vmem>>, %arg3: memref<2x4xf32, #tpu.memory_space<vmem>>, %arg4: memref<4x2xf32, #tpu.memory_space<vmem>>, %arg5: memref<4x1xf32, #tpu.memory_space<vmem>>, %arg6: memref<32x32xbf16, #tpu.memory_space<vmem>>, %arg7: memref<8x4xf32, #tpu.memory_space<vmem>>, %arg8: memref<2x4xf32, #tpu.memory_space<vmem>>, %arg9: memref<4x2xf32, #tpu.memory_space<vmem>>, %arg10: memref<4x1xf32, #tpu.memory_space<vmem>>, %arg11: memref<32x32xbf16, #tpu.memory_space<vmem>>, %arg12: memref<8x4xf32, #tpu.memory_space<vmem>>, %arg13: memref<4x32xf32, #tpu.memory_space<vmem>>, %arg14: memref<128x16xf32, #tpu.memory_space<vmem>>, %arg15: memref<16x128xf32, #tpu.memory_space<vmem>>, %arg16: memref<128x1024xf32, #tpu.memory_space<vmem>>, %arg17: memref<128x1024xf32, #tpu.memory_space<vmem>>, %arg18: memref<1x8x1024xf32, #tpu.memory_space<vmem>>) attributes {dimension_semantics = [#tpu.dimension_semantics<parallel>], iteration_bounds = array<i64: 2>, scalar_prefetch = 0 : i64, scratch_operands = 0 : i64, tpu.core_type = #tpu.core_type<tc>, window_params = [{transform_indices = @transform_0, window_bounds = array<i64: 1, 32, 128>}, {transform_indices = @transform_1, window_bounds = array<i64: 1, 32, 128>}, {pipeline_mode = #tpu.pipeline_mode<synchronous>, transform_indices = @transform_2, window_bounds = array<i64: 2, 4>}, {pipeline_mode = #tpu.pipeline_mode<synchronous>, transform_indices = @transform_3, window_bounds = array<i64: 4, 2>}, {pipeline_mode = #tpu.pipeline_mode<synchronous>, transform_indices = @transform_4, window_bounds = array<i64: 4, 1>}, {pipeline_mode = #tpu.pipeline_mode<synchronous>, transform_indices = @transform_5, window_bounds = array<i64: 32, 32>}, {pipeline_mode = #tpu.pipeline_mode<synchronous>, transform_indices = @transform_6, window_bounds = array<i64: 8, 4>}, {pipeline_mode = #tpu.pipeline_mode<synchronous>, transform_indices = @transform_7, window_bounds = array<i64: 2, 4>}, {pipeline_mode = #tpu.pipeline_mode<synchronous>, transform_indices = @transform_8, window_bounds = array<i64: 4, 2>}, {pipeline_mode = #tpu.pipeline_mode<synchronous>, transform_indices = @transform_9, window_bounds = array<i64: 4, 1>}, {pipeline_mode = #tpu.pipeline_mode<synchronous>, transform_indices = @transform_10, window_bounds = array<i64: 32, 32>}, {pipeline_mode = #tpu.pipeline_mode<synchronous>, transform_indices = @transform_11, window_bounds = array<i64: 8, 4>}, {pipeline_mode = #tpu.pipeline_mode<synchronous>, transform_indices = @transform_12, window_bounds = array<i64: 4, 32>}, {pipeline_mode = #tpu.pipeline_mode<synchronous>, transform_indices = @transform_13, window_bounds = array<i64: 128, 16>}, {pipeline_mode = #tpu.pipeline_mode<synchronous>, transform_indices = @transform_14, window_bounds = array<i64: 16, 128>}, {pipeline_mode = #tpu.pipeline_mode<synchronous>, transform_indices = @transform_15, window_bounds = array<i64: 128, 1024>}, {pipeline_mode = #tpu.pipeline_mode<synchronous>, transform_indices = @transform_16, window_bounds = array<i64: 128, 1024>}, {transform_indices = @transform_17, window_bounds = array<i64: 1, 8, 1024>}]} {
    %c0 = arith.constant 0 : index
    %c0_0 = arith.constant 0 : index
    %c0_1 = arith.constant 0 : index
    %0 = vector.load %arg1[%c0, %c0_0, %c0_1] : memref<1x32x128xbf16, #tpu.memory_space<vmem>>, vector<1x32x128xbf16>
    %1 = vector.shape_cast %0 : vector<1x32x128xbf16> to vector<32x128xbf16>
    %c0_2 = arith.constant 0 : index
    %c0_3 = arith.constant 0 : index
    %c0_4 = arith.constant 0 : index
    %2 = vector.load %arg2[%c0_2, %c0_3, %c0_4] : memref<1x32x128xbf16, #tpu.memory_space<vmem>>, vector<1x32x128xbf16>
    %3 = vector.shape_cast %2 : vector<1x32x128xbf16> to vector<32x128xbf16>
    %c0_5 = arith.constant 0 : index
    %c0_6 = arith.constant 0 : index
    %4 = vector.load %arg13[%c0_5, %c0_6] : memref<4x32xf32, #tpu.memory_space<vmem>>, vector<4x32xf32>
    %5 = arith.extf %1 : vector<32x128xbf16> to vector<32x128xf32>
    %c0_7 = arith.constant 0 : index
    %c0_8 = arith.constant 0 : index
    %6 = vector.load %arg14[%c0_7, %c0_8] : memref<128x16xf32, #tpu.memory_space<vmem>>, vector<128x16xf32>
    %cst = arith.constant dense<0.000000e+00> : vector<32x16xf32>
    %7 = tpu.matmul %5, %6, %cst {dimension_numbers = #tpu.dot_dimension_numbers<[1], [0], [0], [1], [0, 0, 1, 1], [], []>} : vector<32x128xf32>, vector<128x16xf32>, vector<32x16xf32> -> vector<32x16xf32>
    %cst_9 = arith.constant dense<0.000000e+00> : vector<4x16xf32>
    %8 = tpu.matmul %4, %7, %cst_9 {dimension_numbers = #tpu.dot_dimension_numbers<[1], [0], [0], [1], [0, 0, 1, 1], [], []>} : vector<4x32xf32>, vector<32x16xf32>, vector<4x16xf32> -> vector<4x16xf32>
    %c0_10 = arith.constant 0 : index
    %c0_11 = arith.constant 0 : index
    %9 = vector.load %arg3[%c0_10, %c0_11] : memref<2x4xf32, #tpu.memory_space<vmem>>, vector<2x4xf32>
    %cst_12 = arith.constant dense<0.000000e+00> : vector<2x16xf32>
    %10 = tpu.matmul %9, %8, %cst_12 {dimension_numbers = #tpu.dot_dimension_numbers<[1], [0], [0], [1], [0, 0, 1, 1], [], []>} : vector<2x4xf32>, vector<4x16xf32>, vector<2x16xf32> -> vector<2x16xf32>
    %cst_13 = arith.constant 0.000000e+00 : f32
    %11 = vector.broadcast %cst_13 : f32 to vector<2x16xf32>
    %12 = arith.maximumf %10, %11 : vector<2x16xf32>
    %c0_14 = arith.constant 0 : index
    %c0_15 = arith.constant 0 : index
    %13 = vector.load %arg4[%c0_14, %c0_15] : memref<4x2xf32, #tpu.memory_space<vmem>>, vector<4x2xf32>
    %cst_16 = arith.constant dense<0.000000e+00> : vector<4x16xf32>
    %14 = tpu.matmul %13, %12, %cst_16 {dimension_numbers = #tpu.dot_dimension_numbers<[1], [0], [0], [1], [0, 0, 1, 1], [], []>} : vector<4x2xf32>, vector<2x16xf32>, vector<4x16xf32> -> vector<4x16xf32>
    %c0_17 = arith.constant 0 : index
    %c0_18 = arith.constant 0 : index
    %15 = vector.load %arg5[%c0_17, %c0_18] : memref<4x1xf32, #tpu.memory_space<vmem>>, vector<4x1xf32>
    %16 = vector.broadcast %15 : vector<4x1xf32> to vector<4x16xf32>
    %17 = arith.addf %14, %16 : vector<4x16xf32>
    %cst_19 = arith.constant 0.0294117648 : f32
    %18 = vector.broadcast %cst_19 : f32 to vector<4x16xf32>
    %19 = arith.mulf %17, %18 : vector<4x16xf32>
    %cst_20 = arith.constant dense<0xFF800000> : vector<16xf32>
    %20 = vector.multi_reduction <maximumf>, %19, %cst_20 [0] : vector<4x16xf32> to vector<16xf32>
    %21 = vector.shape_cast %20 : vector<16xf32> to vector<1x16xf32>
    %22 = vector.broadcast %21 : vector<1x16xf32> to vector<4x16xf32>
    %23 = arith.subf %19, %22 : vector<4x16xf32>
    %24 = math.exp %23 : vector<4x16xf32>
    %cst_21 = arith.constant dense<0.000000e+00> : vector<16xf32>
    %25 = vector.multi_reduction <add>, %24, %cst_21 [0] : vector<4x16xf32> to vector<16xf32>
    %26 = vector.shape_cast %25 : vector<16xf32> to vector<1x16xf32>
    %27 = tpu.reciprocal %26 {approx = true} : vector<1x16xf32> -> vector<1x16xf32>
    %28 = vector.broadcast %27 : vector<1x16xf32> to vector<4x16xf32>
    %29 = arith.mulf %24, %28 : vector<4x16xf32>
    %c0_22 = arith.constant 0 : index
    %c0_23 = arith.constant 0 : index
    %30 = vector.load %arg8[%c0_22, %c0_23] : memref<2x4xf32, #tpu.memory_space<vmem>>, vector<2x4xf32>
    %cst_24 = arith.constant dense<0.000000e+00> : vector<2x16xf32>
    %31 = tpu.matmul %30, %8, %cst_24 {dimension_numbers = #tpu.dot_dimension_numbers<[1], [0], [0], [1], [0, 0, 1, 1], [], []>} : vector<2x4xf32>, vector<4x16xf32>, vector<2x16xf32> -> vector<2x16xf32>
    %cst_25 = arith.constant 0.000000e+00 : f32
    %32 = vector.broadcast %cst_25 : f32 to vector<2x16xf32>
    %33 = arith.maximumf %31, %32 : vector<2x16xf32>
    %c0_26 = arith.constant 0 : index
    %c0_27 = arith.constant 0 : index
    %34 = vector.load %arg9[%c0_26, %c0_27] : memref<4x2xf32, #tpu.memory_space<vmem>>, vector<4x2xf32>
    %cst_28 = arith.constant dense<0.000000e+00> : vector<4x16xf32>
    %35 = tpu.matmul %34, %33, %cst_28 {dimension_numbers = #tpu.dot_dimension_numbers<[1], [0], [0], [1], [0, 0, 1, 1], [], []>} : vector<4x2xf32>, vector<2x16xf32>, vector<4x16xf32> -> vector<4x16xf32>
    %c0_29 = arith.constant 0 : index
    %c0_30 = arith.constant 0 : index
    %36 = vector.load %arg10[%c0_29, %c0_30] : memref<4x1xf32, #tpu.memory_space<vmem>>, vector<4x1xf32>
    %37 = vector.broadcast %36 : vector<4x1xf32> to vector<4x16xf32>
    %38 = arith.addf %35, %37 : vector<4x16xf32>
    %cst_31 = arith.constant 0.0294117648 : f32
    %39 = vector.broadcast %cst_31 : f32 to vector<4x16xf32>
    %40 = arith.mulf %38, %39 : vector<4x16xf32>
    %cst_32 = arith.constant dense<0xFF800000> : vector<16xf32>
    %41 = vector.multi_reduction <maximumf>, %40, %cst_32 [0] : vector<4x16xf32> to vector<16xf32>
    %42 = vector.shape_cast %41 : vector<16xf32> to vector<1x16xf32>
    %43 = vector.broadcast %42 : vector<1x16xf32> to vector<4x16xf32>
    %44 = arith.subf %40, %43 : vector<4x16xf32>
    %45 = math.exp %44 : vector<4x16xf32>
    %cst_33 = arith.constant dense<0.000000e+00> : vector<16xf32>
    %46 = vector.multi_reduction <add>, %45, %cst_33 [0] : vector<4x16xf32> to vector<16xf32>
    %47 = vector.shape_cast %46 : vector<16xf32> to vector<1x16xf32>
    %48 = tpu.reciprocal %47 {approx = true} : vector<1x16xf32> -> vector<1x16xf32>
    %49 = vector.broadcast %48 : vector<1x16xf32> to vector<4x16xf32>
    %50 = arith.mulf %45, %49 : vector<4x16xf32>
    %c0_34 = arith.constant 0 : index
    %c0_35 = arith.constant 0 : index
    %51 = vector.load %arg6[%c0_34, %c0_35] : memref<32x32xbf16, #tpu.memory_space<vmem>>, vector<32x32xbf16>
    %cst_36 = arith.constant dense<0.000000e+00> : vector<32x128xf32>
    %52 = tpu.matmul %51, %1, %cst_36 {dimension_numbers = #tpu.dot_dimension_numbers<[1], [0], [0], [1], [0, 0, 1, 1], [], []>} : vector<32x32xbf16>, vector<32x128xbf16>, vector<32x128xf32> -> vector<32x128xf32>
    %c0_37 = arith.constant 0 : index
    %c0_38 = arith.constant 0 : index
    %53 = vector.load %arg11[%c0_37, %c0_38] : memref<32x32xbf16, #tpu.memory_space<vmem>>, vector<32x32xbf16>
    %cst_39 = arith.constant dense<0.000000e+00> : vector<32x128xf32>
    %54 = tpu.matmul %53, %3, %cst_39 {dimension_numbers = #tpu.dot_dimension_numbers<[1], [0], [0], [1], [0, 0, 1, 1], [], []>} : vector<32x32xbf16>, vector<32x128xbf16>, vector<32x128xf32> -> vector<32x128xf32>
    %c0_40 = arith.constant 0 : index
    %c0_41 = arith.constant 0 : index
    %55 = vector.load %arg15[%c0_40, %c0_41] : memref<16x128xf32, #tpu.memory_space<vmem>>, vector<16x128xf32>
    %cst_42 = arith.constant dense<0.000000e+00> : vector<4x128xf32>
    %56 = tpu.matmul %29, %55, %cst_42 {dimension_numbers = #tpu.dot_dimension_numbers<[1], [0], [0], [1], [0, 0, 1, 1], [], []>} : vector<4x16xf32>, vector<16x128xf32>, vector<4x128xf32> -> vector<4x128xf32>
    %c0_43 = arith.constant 0 : index
    %c0_44 = arith.constant 0 : index
    %57 = vector.load %arg15[%c0_43, %c0_44] : memref<16x128xf32, #tpu.memory_space<vmem>>, vector<16x128xf32>
    %cst_45 = arith.constant dense<0.000000e+00> : vector<4x128xf32>
    %58 = tpu.matmul %50, %57, %cst_45 {dimension_numbers = #tpu.dot_dimension_numbers<[1], [0], [0], [1], [0, 0, 1, 1], [], []>} : vector<4x16xf32>, vector<16x128xf32>, vector<4x128xf32> -> vector<4x128xf32>
    %59 = vector.extract_strided_slice %56 {offsets = [0, 0], sizes = [1, 128], strides = [1, 1]} : vector<4x128xf32> to vector<1x128xf32>
    %60 = vector.extract_strided_slice %52 {offsets = [0, 0], sizes = [8, 128], strides = [1, 1]} : vector<32x128xf32> to vector<8x128xf32>
    %61 = vector.broadcast %59 : vector<1x128xf32> to vector<8x128xf32>
    %62 = arith.mulf %61, %60 : vector<8x128xf32>
    %63 = vector.extract_strided_slice %58 {offsets = [0, 0], sizes = [1, 128], strides = [1, 1]} : vector<4x128xf32> to vector<1x128xf32>
    %64 = vector.extract_strided_slice %54 {offsets = [0, 0], sizes = [8, 128], strides = [1, 1]} : vector<32x128xf32> to vector<8x128xf32>
    %65 = vector.broadcast %63 : vector<1x128xf32> to vector<8x128xf32>
    %66 = arith.mulf %65, %64 : vector<8x128xf32>
    %67 = vector.extract_strided_slice %56 {offsets = [1, 0], sizes = [1, 128], strides = [1, 1]} : vector<4x128xf32> to vector<1x128xf32>
    %68 = vector.extract_strided_slice %52 {offsets = [8, 0], sizes = [8, 128], strides = [1, 1]} : vector<32x128xf32> to vector<8x128xf32>
    %69 = vector.broadcast %67 : vector<1x128xf32> to vector<8x128xf32>
    %70 = arith.mulf %69, %68 : vector<8x128xf32>
    %71 = arith.addf %62, %70 : vector<8x128xf32>
    %72 = vector.extract_strided_slice %58 {offsets = [1, 0], sizes = [1, 128], strides = [1, 1]} : vector<4x128xf32> to vector<1x128xf32>
    %73 = vector.extract_strided_slice %54 {offsets = [8, 0], sizes = [8, 128], strides = [1, 1]} : vector<32x128xf32> to vector<8x128xf32>
    %74 = vector.broadcast %72 : vector<1x128xf32> to vector<8x128xf32>
    %75 = arith.mulf %74, %73 : vector<8x128xf32>
    %76 = arith.addf %66, %75 : vector<8x128xf32>
    %77 = vector.extract_strided_slice %56 {offsets = [2, 0], sizes = [1, 128], strides = [1, 1]} : vector<4x128xf32> to vector<1x128xf32>
    %78 = vector.extract_strided_slice %52 {offsets = [16, 0], sizes = [8, 128], strides = [1, 1]} : vector<32x128xf32> to vector<8x128xf32>
    %79 = vector.broadcast %77 : vector<1x128xf32> to vector<8x128xf32>
    %80 = arith.mulf %79, %78 : vector<8x128xf32>
    %81 = arith.addf %71, %80 : vector<8x128xf32>
    %82 = vector.extract_strided_slice %58 {offsets = [2, 0], sizes = [1, 128], strides = [1, 1]} : vector<4x128xf32> to vector<1x128xf32>
    %83 = vector.extract_strided_slice %54 {offsets = [16, 0], sizes = [8, 128], strides = [1, 1]} : vector<32x128xf32> to vector<8x128xf32>
    %84 = vector.broadcast %82 : vector<1x128xf32> to vector<8x128xf32>
    %85 = arith.mulf %84, %83 : vector<8x128xf32>
    %86 = arith.addf %76, %85 : vector<8x128xf32>
    %87 = vector.extract_strided_slice %56 {offsets = [3, 0], sizes = [1, 128], strides = [1, 1]} : vector<4x128xf32> to vector<1x128xf32>
    %88 = vector.extract_strided_slice %52 {offsets = [24, 0], sizes = [8, 128], strides = [1, 1]} : vector<32x128xf32> to vector<8x128xf32>
    %89 = vector.broadcast %87 : vector<1x128xf32> to vector<8x128xf32>
    %90 = arith.mulf %89, %88 : vector<8x128xf32>
    %91 = arith.addf %81, %90 : vector<8x128xf32>
    %92 = vector.extract_strided_slice %58 {offsets = [3, 0], sizes = [1, 128], strides = [1, 1]} : vector<4x128xf32> to vector<1x128xf32>
    %93 = vector.extract_strided_slice %54 {offsets = [24, 0], sizes = [8, 128], strides = [1, 1]} : vector<32x128xf32> to vector<8x128xf32>
    %94 = vector.broadcast %92 : vector<1x128xf32> to vector<8x128xf32>
    %95 = arith.mulf %94, %93 : vector<8x128xf32>
    %96 = arith.addf %86, %95 : vector<8x128xf32>
    %c0_46 = arith.constant 0 : index
    %c0_47 = arith.constant 0 : index
    %97 = vector.load %arg7[%c0_46, %c0_47] : memref<8x4xf32, #tpu.memory_space<vmem>>, vector<8x4xf32>
    %cst_48 = arith.constant dense<0.000000e+00> : vector<8x16xf32>
    %98 = tpu.matmul %97, %29, %cst_48 {dimension_numbers = #tpu.dot_dimension_numbers<[1], [0], [0], [1], [0, 0, 1, 1], [], []>} : vector<8x4xf32>, vector<4x16xf32>, vector<8x16xf32> -> vector<8x16xf32>
    %c0_49 = arith.constant 0 : index
    %c0_50 = arith.constant 0 : index
    %99 = vector.load %arg12[%c0_49, %c0_50] : memref<8x4xf32, #tpu.memory_space<vmem>>, vector<8x4xf32>
    %cst_51 = arith.constant dense<0.000000e+00> : vector<8x16xf32>
    %100 = tpu.matmul %99, %50, %cst_51 {dimension_numbers = #tpu.dot_dimension_numbers<[1], [0], [0], [1], [0, 0, 1, 1], [], []>} : vector<8x4xf32>, vector<4x16xf32>, vector<8x16xf32> -> vector<8x16xf32>
    %101 = arith.addf %98, %100 : vector<8x16xf32>
    %c0_52 = arith.constant 0 : index
    %c0_53 = arith.constant 0 : index
    %102 = vector.load %arg15[%c0_52, %c0_53] : memref<16x128xf32, #tpu.memory_space<vmem>>, vector<16x128xf32>
    %cst_54 = arith.constant dense<0.000000e+00> : vector<8x128xf32>
    %103 = tpu.matmul %101, %102, %cst_54 {dimension_numbers = #tpu.dot_dimension_numbers<[1], [0], [0], [1], [0, 0, 1, 1], [], []>} : vector<8x16xf32>, vector<16x128xf32>, vector<8x128xf32> -> vector<8x128xf32>
    %104 = arith.addf %91, %103 : vector<8x128xf32>
    %c0_55 = arith.constant 0 : index
    %c0_56 = arith.constant 0 : index
    %105 = vector.load %arg16[%c0_55, %c0_56] : memref<128x1024xf32, #tpu.memory_space<vmem>>, vector<128x1024xf32>
    %cst_57 = arith.constant dense<0.000000e+00> : vector<8x1024xf32>
    %106 = tpu.matmul %104, %105, %cst_57 {dimension_numbers = #tpu.dot_dimension_numbers<[1], [0], [0], [1], [0, 0, 1, 1], [], []>} : vector<8x128xf32>, vector<128x1024xf32>, vector<8x1024xf32> -> vector<8x1024xf32>
    %c0_58 = arith.constant 0 : index
    %c0_59 = arith.constant 0 : index
    %107 = vector.load %arg17[%c0_58, %c0_59] : memref<128x1024xf32, #tpu.memory_space<vmem>>, vector<128x1024xf32>
    %cst_60 = arith.constant dense<0.000000e+00> : vector<8x1024xf32>
    %108 = tpu.matmul %96, %107, %cst_60 {dimension_numbers = #tpu.dot_dimension_numbers<[1], [0], [0], [1], [0, 0, 1, 1], [], []>} : vector<8x128xf32>, vector<128x1024xf32>, vector<8x1024xf32> -> vector<8x1024xf32>
    %109 = arith.addf %106, %108 : vector<8x1024xf32>
    %c0_61 = arith.constant 0 : index
    %c0_62 = arith.constant 0 : index
    %c0_63 = arith.constant 0 : index
    %110 = vector.load %arg18[%c0_61, %c0_62, %c0_63] : memref<1x8x1024xf32, #tpu.memory_space<vmem>>, vector<1x8x1024xf32>
    %111 = vector.shape_cast %110 : vector<1x8x1024xf32> to vector<8x1024xf32>
    %112 = vector.shape_cast %109 : vector<8x1024xf32> to vector<1x8x1024xf32>
    tpu.vector_store %arg18[%c0_61, %c0_62, %c0_63], %112 {strides = array<i32>} : memref<1x8x1024xf32, #tpu.memory_space<vmem>>, vector<1x8x1024xf32>,
    return
  }
  func.func @transform_0(%arg0: i32) -> (i32, i32, i32) {
    %c0_i32 = arith.constant 0 : i32
    %c0_i32_0 = arith.constant 0 : i32
    %c0_i32_1 = arith.constant 0 : i32
    return %arg0, %c0_i32, %c0_i32_0 : i32, i32, i32
  }
  func.func @transform_1(%arg0: i32) -> (i32, i32, i32) {
    %c0_i32 = arith.constant 0 : i32
    %c0_i32_0 = arith.constant 0 : i32
    %c0_i32_1 = arith.constant 0 : i32
    return %arg0, %c0_i32, %c0_i32_0 : i32, i32, i32
  }
  func.func @transform_2(%arg0: i32) -> (i32, i32) {
    %c0_i32 = arith.constant 0 : i32
    %c0_i32_0 = arith.constant 0 : i32
    %c0_i32_1 = arith.constant 0 : i32
    return %c0_i32, %c0_i32_0 : i32, i32
  }
  func.func @transform_3(%arg0: i32) -> (i32, i32) {
    %c0_i32 = arith.constant 0 : i32
    %c0_i32_0 = arith.constant 0 : i32
    %c0_i32_1 = arith.constant 0 : i32
    return %c0_i32, %c0_i32_0 : i32, i32
  }
  func.func @transform_4(%arg0: i32) -> (i32, i32) {
    %c0_i32 = arith.constant 0 : i32
    %c0_i32_0 = arith.constant 0 : i32
    %c0_i32_1 = arith.constant 0 : i32
    return %c0_i32, %c0_i32_0 : i32, i32
  }
  func.func @transform_5(%arg0: i32) -> (i32, i32) {
    %c0_i32 = arith.constant 0 : i32
    %c0_i32_0 = arith.constant 0 : i32
    %c0_i32_1 = arith.constant 0 : i32
    return %c0_i32, %c0_i32_0 : i32, i32
  }
  func.func @transform_6(%arg0: i32) -> (i32, i32) {
    %c0_i32 = arith.constant 0 : i32
    %c0_i32_0 = arith.constant 0 : i32
    %c0_i32_1 = arith.constant 0 : i32
    return %c0_i32, %c0_i32_0 : i32, i32
  }
  func.func @transform_7(%arg0: i32) -> (i32, i32) {
    %c0_i32 = arith.constant 0 : i32
    %c0_i32_0 = arith.constant 0 : i32
    %c0_i32_1 = arith.constant 0 : i32
    return %c0_i32, %c0_i32_0 : i32, i32
  }
  func.func @transform_8(%arg0: i32) -> (i32, i32) {
    %c0_i32 = arith.constant 0 : i32
    %c0_i32_0 = arith.constant 0 : i32
    %c0_i32_1 = arith.constant 0 : i32
    return %c0_i32, %c0_i32_0 : i32, i32
  }
  func.func @transform_9(%arg0: i32) -> (i32, i32) {
    %c0_i32 = arith.constant 0 : i32
    %c0_i32_0 = arith.constant 0 : i32
    %c0_i32_1 = arith.constant 0 : i32
    return %c0_i32, %c0_i32_0 : i32, i32
  }
  func.func @transform_10(%arg0: i32) -> (i32, i32) {
    %c0_i32 = arith.constant 0 : i32
    %c0_i32_0 = arith.constant 0 : i32
    %c0_i32_1 = arith.constant 0 : i32
    return %c0_i32, %c0_i32_0 : i32, i32
  }
  func.func @transform_11(%arg0: i32) -> (i32, i32) {
    %c0_i32 = arith.constant 0 : i32
    %c0_i32_0 = arith.constant 0 : i32
    %c0_i32_1 = arith.constant 0 : i32
    return %c0_i32, %c0_i32_0 : i32, i32
  }
  func.func @transform_12(%arg0: i32) -> (i32, i32) {
    %c0_i32 = arith.constant 0 : i32
    %c0_i32_0 = arith.constant 0 : i32
    %c0_i32_1 = arith.constant 0 : i32
    return %c0_i32, %c0_i32_0 : i32, i32
  }
  func.func @transform_13(%arg0: i32) -> (i32, i32) {
    %c0_i32 = arith.constant 0 : i32
    %c0_i32_0 = arith.constant 0 : i32
    %c0_i32_1 = arith.constant 0 : i32
    return %c0_i32, %c0_i32_0 : i32, i32
  }
  func.func @transform_14(%arg0: i32) -> (i32, i32) {
    %c0_i32 = arith.constant 0 : i32
    %c0_i32_0 = arith.constant 0 : i32
    %c0_i32_1 = arith.constant 0 : i32
    return %c0_i32, %c0_i32_0 : i32, i32
  }
  func.func @transform_15(%arg0: i32) -> (i32, i32) {
    %c0_i32 = arith.constant 0 : i32
    %c0_i32_0 = arith.constant 0 : i32
    %c0_i32_1 = arith.constant 0 : i32
    return %c0_i32, %c0_i32_0 : i32, i32
  }
  func.func @transform_16(%arg0: i32) -> (i32, i32) {
    %c0_i32 = arith.constant 0 : i32
    %c0_i32_0 = arith.constant 0 : i32
    %c0_i32_1 = arith.constant 0 : i32
    return %c0_i32, %c0_i32_0 : i32, i32
  }
  func.func @transform_17(%arg0: i32) -> (i32, i32, i32) {
    %c0_i32 = arith.constant 0 : i32
    %c0_i32_0 = arith.constant 0 : i32
    %c0_i32_1 = arith.constant 0 : i32
    return %arg0, %c0_i32, %c0_i32_0 : i32, i32, i32
  }
}

</mosaic_0001>

<bundles_post_ra>
// kernel: e2e_dynamic_forward.1
= control target key start
LH: loop header
LB: loop body
LE: loop exit
PB: predicated region body
PF: predicated region fallthrough
CT: control target
= control target key end

     0   :  { %s3264_s24 = smov 0   ;;  %s4281_s0 = inlined_call_operand.vmem [shape: bf16[2,32,128], index: 0, kind: input, shape index: {}]   ;;  %s4282_s1 = inlined_call_operand.vmem [shape: bf16[2,32,128], index: 1, kind: input, shape index: {}]   ;;  %s4283_s2 = inlined_call_operand.vmem [shape: f32[2,4], index: 2, kind: input, shape index: {}]   ;;  %s4284_s3 = inlined_call_operand.vmem [shape: f32[4,2], index: 3, kind: input, shape index: {}]   ;;  %s4285_s4 = inlined_call_operand.vmem [shape: f32[4,1], index: 4, kind: input, shape index: {}]   ;;  %s4286_s5 = inlined_call_operand.vmem [shape: bf16[32,32], index: 5, kind: input, shape index: {}]   ;;  %s4287_s6 = inlined_call_operand.vmem [shape: f32[8,4], index: 6, kind: input, shape index: {}]   ;;  %s4288_s7 = inlined_call_operand.vmem [shape: f32[2,4], index: 7, kind: input, shape index: {}]   ;;  %s4289_s8 = inlined_call_operand.vmem [shape: f32[4,2], index: 8, kind: input, shape index: {}]   ;;  %s4290_s9 = inlined_call_operand.vmem [shape: f32[4,1], index: 9, kind: input, shape index: {}]   ;;  %s4291_s10 = inlined_call_operand.vmem [shape: bf16[32,32], index: 10, kind: input, shape index: {}]   ;;  %s4292_s11 = inlined_call_operand.vmem [shape: f32[8,4], index: 11, kind: input, shape index: {}]   ;;  %s4293_s12 = inlined_call_operand.vmem [shape: f32[4,32], index: 12, kind: input, shape index: {}]   ;;  %s4294_s13 = inlined_call_operand.vmem [shape: f32[128,16], index: 13, kind: input, shape index: {}]   ;;  %s4295_s14 = inlined_call_operand.vmem [shape: f32[16,128], index: 14, kind: input, shape index: {}]   ;;  %s4296_s15 = inlined_call_operand.vmem [shape: f32[128,1024], index: 15, kind: input, shape index: {}]   ;;  %s4297_s16 = inlined_call_operand.vmem [shape: f32[128,1024], index: 16, kind: input, shape index: {}]   ;;  %s4298_s17 = inlined_call_operand.vmem [shape: f32[2,8,1024], index: 17, kind: output, shape index: {}]  }
   0x1   :  { %4299 = sst [smem:[#allocation2_spill]] %s4281_s0 }
   0x2   :  { %4300 = sst [smem:[#allocation3_spill]] %s4282_s1 }
   0x3 LB: > { %s2604_s25 = sadd.s32 4294967295, %s3168_s24   ;;  %p2608_p0 = scmp.ge.s32.totalorder %s3168_s24, 1  ;;  %s3168_s24 = sphi %s3264_s24, %s27_s24  }
   0x4   : > { %p497_p1 = scmp.lt.s32.totalorder %s3168_s24, 3 }
   0x6   : > { %p498_p2 = pnand %p2608_p0, %p497_p1 }
   0x7   : > { %v583_v0 = vld [vmem:[%s4294_s13] sm:$0xff] (!%p498_p2)  ;;  %v584_v1 = vld [vmem:[%s4294_s13 + $0x8] sm:$0xff] (!%p498_p2)  ;;  %v585_v2 = vld [vmem:[%s4294_s13 + $0x10] sm:$0xff] (!%p498_p2)  ;;  %p554_p3 = scmp.lt.s32.totalorder (!%p498_p2), %s2604_s25, 1  ;;  %s4301_s0 = sld [smem:[#allocation2_spill]] (!%p498_p2)  ;;  %v3170_v30 = vmov (!%p498_p2), 0.0|0.0  }
   0x8   : > { %501 = sbr.rel (%p498_p2) target bundleno = 1862 (0x746), region = 88  ;;  %v2818_v3 = vpack.c.bf16 (!%p498_p2), %v584_v1, %v583_v0  ;;  %v586_v4 = vld [vmem:[%s4294_s13 + $0x18] sm:$0xff] (!%p498_p2)  ;;  %v587_v6 = vld [vmem:[%s4294_s13 + $0x20] sm:$0xff] (!%p498_p2)  ;;  %v588_v7 = vld [vmem:[%s4294_s13 + $0x28] sm:$0xff] (!%p498_p2)  ;;  %s4302_s21 = sld [smem:[#allocation3_spill]] (!%p498_p2)  ;;  %2850 = vmatprep.subr.bf16.mxu1 (!%p498_p2), %v3170_v30  ;;  %vm3171_vm0 = vmmov (!%p498_p2), 0  }
   0x9   : > { %v2822_v5 = vpack.c.bf16 (!%p498_p2), %v586_v4, %v585_v2  ;;  %v2826_v8 = vpack.c.bf16 (!%p498_p2), %v588_v7, %v587_v6  ;;  %v589_v9 = vld [vmem:[%s4294_s13 + $0x30] sm:$0xff] (!%p498_p2)  ;;  %v590_v10 = vld [vmem:[%s4294_s13 + $0x38] sm:$0xff] (!%p498_p2)  ;;  %v591_v14 = vld [vmem:[%s4294_s13 + $0x40] sm:$0xff] (!%p498_p2)  ;;  %v3172_v31 = vmov (!%p498_p2), 0.0   ;;  %vm684_vm1 = vcmask (!%p498_p2), 261120  }
   0xa   : > { %2819 = vmatprep.subr.bf16.mxu0 (!%p498_p2), %v2818_v3  ;;  %v2830_v13 = vpack.c.bf16 (!%p498_p2), %v590_v10, %v589_v9  ;;  %v592_v15 = vld [vmem:[%s4294_s13 + $0x48] sm:$0xff] (!%p498_p2)  ;;  %v593_v17 = vld [vmem:[%s4294_s13 + $0x50] sm:$0xff] (!%p498_p2)  ;;  %v594_v18 = vld [vmem:[%s4294_s13 + $0x58] sm:$0xff] (!%p498_p2)  ;;  %2748 = vmatprep.mubr.msk.f32.mxu1 (!%p498_p2), %vm3171_vm0, %v3172_v31  ;;  %vm763_vm2 = vcmask (!%p498_p2), 1043456   ;;  %vm759_vm3 = vcmask (!%p498_p2), 31744   ;;  %v3173_v43 = vmov (!%p498_p2), 0  }
   0xb   : > { %2821 = vmatpush3.bf16.msra.mxu0 (!%p498_p2), %v2818_v3  ;;  %v2834_v16 = vpack.c.bf16 (!%p498_p2), %v592_v15, %v591_v14  ;;  %v2838_v19 = vpack.c.bf16 (!%p498_p2), %v594_v18, %v593_v17  ;;  %v595_v20 = vld [vmem:[%s4294_s13 + $0x60] sm:$0xff] (!%p498_p2)  ;;  %v596_v21 = vld [vmem:[%s4294_s13 + $0x68] sm:$0xff] (!%p498_p2)  ;;  %v597_v23 = vld [vmem:[%s4294_s13 + $0x70] sm:$0xff] (!%p498_p2)  ;;  %3143 = vset.pattern.permute.xlu0 (!%p498_p2), %v3173_v43  ;;  %vm849_vm4 = vcmask (!%p498_p2), 1041408   ;;  %vm845_vm5 = vcmask (!%p498_p2), 15360  }
   0xc   : > { %2823 = vmatprep.subr.bf16.mxu0 (!%p498_p2), %v2822_v5  ;;  %v2842_v22 = vpack.c.bf16 (!%p498_p2), %v596_v21, %v595_v20  ;;  %v598_v24 = vld [vmem:[%s4294_s13 + $0x78] sm:$0xff] (!%p498_p2)  ;;  %v578_v38 = vld [vmem:[%s4293_s12] sm:$0xf] (!%p498_p2)  ;;  %vm924_vm6 = vcmask (!%p498_p2), 125952   ;;  %v1285_v2 = vld [vmem:[%s4295_s14 + $0x8] sm:$0xff] (!%p498_p2)  ;;  %vm1286_vm7 = vcmask (!%p498_p2), 130048  }
   0xd   : > { %v2846_v25 = vpack.c.bf16 (!%p498_p2), %v598_v24, %v597_v23  ;;  %v758_v39 = vld [vmem:[%s4283_s2] sm:$0x3] (!%p498_p2)  ;;  %v3147_v4 = vld [vmem:[%s4286_s5 + $0x8] sm:$0xff] (!%p498_p2)  }
   0xe   : > { %v1020_v42 = vld [vmem:[%s4290_s9] sm:$0xf] (!%p498_p2)  ;;  %v3151_v23 = vld [vmem:[%s4291_s10 + $0x8] sm:$0xff] (!%p498_p2)  }
   0xf   : > { %s4304_s25 = smov (!%p554_p3, %s2604_s25), 1  ;;  %2825 = vmatpush3.bf16.msra.mxu0 %v2822_v5  ;;  %1023 = vperm.xlu0 %3143, %v1020_v42   ;;  %v839_v44 = vld [vmem:[%s4285_s4] sm:$0xf] }
  0x10   : > { %s2645_s23 = sshll.u32 %s4304_s25, 4  ;;  %2827 = vmatprep.subr.bf16.mxu0 %v2826_v8  ;;  %v838_v48 = vld [vmem:[%s4284_s3] sm:$0xf]  ;;  %s2647_s29 = sshll.u32 %s4304_s25, 6 }
  0x11   : > { %s3299_s30 = scalar_lea.vmem %s4301_s0, %s2645_s23  ;;  %s3307_s22 = scalar_lea.vmem %s4302_s21, %s2645_s23  ;;  %v944_v49 = vld [vmem:[%s4288_s7] sm:$0x3] }
  0x12   : > { %v3310_v11 = vld [vmem:[%s3299_s30] sm:$0xff]   ;;  %v3338_v26 = vld [vmem:[%s3299_s30 + $0x8] sm:$0xff]   ;;  %s568_s0 = scalar_lea.vmem %s4298_s17, %s2647_s29 }
  0x13   : > { %v579_v12 = vunpack.c.l.bf16 %v3310_v11  ;;  %2829 = vmatpush3.bf16.msra.mxu0 %v2826_v8  ;;  %v580_v27 = vunpack.c.h.bf16 %v3310_v11  ;;  %v581_v28 = vunpack.c.l.bf16 %v3338_v26  ;;  %v582_v29 = vunpack.c.h.bf16 %v3338_v26  ;;  %842 = vperm.xlu0 %3143, %v839_v44   ;;  %v1019_v60 = vld [vmem:[%s4289_s8] sm:$0xf]  ;;  %v3149_v21 = vld [vmem:[%s3307_s22 + $0x8] sm:$0xff]  }
  0x14   : > { %2831 = vmatprep.subr.bf16.mxu0 %v2830_v13  ;;  %v3146_v61 = vld [vmem:[%s4286_s5] sm:$0xff]  }
  0x15   : > { %2734 = vmatprep.mubr.f32.mxu0 %v579_v12  ;;  %v1284_v1 = vld [vmem:[%s4295_s14] sm:$0xff] }
  0x16   : > { %v3409_v5 = vpack.c.bf16 %v1285_v2, %v1284_v1  ;;  %v3148_v20 = vld [vmem:[%s3307_s22] sm:$0xff]   ;;  %v1836_v2 = vld [vmem:[%s4297_s16 + $0x18] sm:$0xff] }
  0x17   : > { %2833 = vmatpush3.bf16.msra.mxu0 %v2830_v13 }
  0x18   : > { %2835 = vmatprep.subr.bf16.mxu0 %v2834_v16 }
  0x1b   : > { %2837 = vmatpush3.bf16.msra.mxu0 %v2834_v16 }
  0x1c   : > { %2839 = vmatprep.subr.bf16.mxu0 %v2838_v19 }
  0x1f   : > { %2841 = vmatpush3.bf16.msra.mxu0 %v2838_v19 }
  0x20   : > { %2843 = vmatprep.subr.bf16.mxu0 %v2842_v22 }
  0x23   : > { %2845 = vmatpush3.bf16.msra.mxu0 %v2842_v22  ;;  %v3150_v22 = vld [vmem:[%s4291_s10] sm:$0xff]  }
  0x24   : > { %2847 = vmatprep.subr.bf16.mxu0 %v2846_v25 }
  0x27   : > { %2849 = vmatpush3.bf16.msra.mxu0 %v2846_v25 }
  0x28   : > { %2779 = vmatprep.subr.bf16.mxu0 %v3148_v20 }
  0x2a   : > { %2735 = vmatmul.mubr.f32.vlgmr.msra.gmra.mrb[0].mxu0 %v580_v27 }
  0x2b   : > { %2737 = vmatprep.mubr.f32.mxu0 %v581_v28  ;;  %2780 = vmatpush3.bf16.msra.mxu0 %v3148_v20  ;;  %v1868_v20 = vld [vmem:[%s4297_s16 + $0x118] sm:$0xff] }
  0x2c   : > { %2781 = vmatprep.subr.bf16.mxu0 %v3149_v21 }
  0x2e   : > { %2738 = vmatmul.mubr.f32.gmra.mrb[2].mxu0 %v582_v29 }
  0x2f   : > { %2782 = vmatpush3.bf16.msra.mxu0 %v3149_v21  ;;  %2783 = vmatprep.mubr.msk.bf16.mxu0 %vm684_vm1, %v3150_v22  ;;  %v1876_v21 = vld [vmem:[%s4297_s16 + $0x158] sm:$0xff] }
  0x30   : > { %2801 = vmatprep.subr.mxu0 %v3172_v31 }
  0x32   : > { %2784 = vmatmul.mubr.msk.bf16.vlgmr.msra.gmra.mrb[4].mxu0 %vm684_vm1, %v3151_v23  ;;  %v2905_v23 = vpack.c.bf16 %v1876_v21, %v1868_v20  ;;  %v1833_v20 = vld [vmem:[%s4297_s16] sm:$0xff]  ;;  %v1858_v21 = vld [vmem:[%s4297_s16 + $0xc8] sm:$0xff] }
  0x33   : > { %2803 = vmatprep.mubr.msk.f32.mxu0 %vm3171_vm0, %v3172_v31 }
  0x8e   : > { %v3384_v50 = vpop.permute.xlu0 %1023 }
  0x92   : > { %v843_v51 = vpop.permute.xlu0 %842 }
  0xfd   : > { %v2736_v32 = vpop.f32.mrb[0].mxu0 }
  0xfe   : > { %v665_v33 = vpop.f32.mrb[1].mxu0 }
  0xff   : > { %v2851_v34 = vpack.c.bf16 %v2736_v32, %v665_v33 }
 0x101   : > { %v2739_v35 = vpop.f32.mrb[2].mxu0  ;;  %2852 = vmatpush3.bf16.msra.mxu1 %v2851_v34 }
 0x102   : > { %v675_v36 = vpop.f32.mrb[3].mxu0  ;;  %2853 = vmatprep.subr.bf16.mxu1 %v3170_v30 }
 0x103   : > { %v2854_v37 = vpack.c.bf16 %v2739_v35, %v675_v36 }
 0x105   : > { %2855 = vmatpush3.bf16.msra.mxu1 %v2854_v37 }
 0x106   : > { %2751 = vmatprep.subr.mxu1 %v3172_v31 }
 0x108   : > { %2749 = vmatmul.mubr.msk.f32.vlgmr.msra.gmra.mrb[0].mxu1 %vm684_vm1, %v578_v38 }
 0x109   : > { %2753 = vmatprep.mubr.msk.f32.mxu1 %vm3171_vm0, %v3172_v31 }
 0x1db   : > { %v754_v40 = vpop.f32.mrb[0].mxu1 }
 0x1dc   : > { %v2750_v41 = vpop.f32.mrb[1].mxu1  ;;  %2752 = vmatpush3.msk.msra.mxu1 %vm763_vm2, %v754_v40 }
 0x1dd   : > { %2754 = vmatmul.mubr.msk.f32.vlgmr.msra.gmra.mrb[2].mxu1 %vm759_vm3, %v758_v39  ;;  %2756 = vmatprep.subr.mxu1 %v3172_v31 }
 0x1de   : > { %2758 = vmatprep.mubr.msk.f32.mxu1 %vm3171_vm0, %v3172_v31 }
 0x2b0   : > { %v833_v45 = vpop.f32.mrb[2].mxu1 }
 0x2b1   : > { %v837_v46 = vmax.f32 %v833_v45, 0.0  ;;  %v2755_v47 = vpop.f32.mrb[3].mxu1 }
 0x2b3   : > { %2757 = vmatpush3.msk.msra.mxu1 %vm849_vm4, %v837_v46 }
 0x2b4   : > { %2759 = vmatmul.mubr.msk.f32.vlgmr.msra.gmra.mrb[4].mxu1 %vm845_vm5, %v838_v48  ;;  %2761 = vmatprep.subr.mxu1 %v3172_v31  ;;  %v1433_v48 = vlaneseq }
 0x2b5   : > { %2762 = vmatpush3.msk.msra.mxu1 %vm763_vm2, %v754_v40  ;;  %2763 = vmatprep.mubr.msk.f32.mxu1 %vm3171_vm0, %v3172_v31 }
 0x2b6   : > { %2766 = vmatprep.subr.mxu1 %v3172_v31 }
 0x2b8   : > { %2764 = vmatmul.mubr.msk.f32.vlgmr.msra.gmra.mrb[6].mxu1 %vm759_vm3, %v944_v49 }
 0x2b9   : > { %2768 = vmatprep.mubr.msk.f32.mxu1 %vm3171_vm0, %v3172_v31 }
 0x387   : > { %v919_v52 = vpop.f32.mrb[4].mxu1 }
 0x388   : > { %v920_v53 = vadd.f32 %v919_v52, %v843_v51  ;;  %v2760_v54 = vpop.f32.mrb[5].mxu1  ;;  %v3442_v51 = vshrl.u32 %v1433_v48, 7 }
 0x38a   : > { %v923_v55 = vmul.f32 0.029411765, %v920_v53  ;;  %v1435_v52 = vsub.s32 0, %v3442_v51  ;;  %v1445_v53 = vsub.s32 1, %v3442_v51  ;;  %v1457_v54 = vsub.s32 2, %v3442_v51 }
 0x38b   : > { %v1014_v56 = vpop.f32.mrb[6].mxu1 }
 0x38c   : > { %v925_v57 = vsel %vm924_vm6, %v923_v55, -inf  ;;  %v1018_v58 = vmax.f32 %v1014_v56, 0.0  ;;  %v2765_v59 = vpop.f32.mrb[7].mxu1 }
 0x38d   : > { %v926_v62 = vrot.slane %v925_v57, 4 }
 0x38e   : > { %2767 = vmatpush3.msk.msra.mxu1 %vm849_vm4, %v1018_v58 }
 0x38f   : > { %v927_v63 = vmax.f32 %v925_v57, %v926_v62  ;;  %2769 = vmatmul.mubr.msk.f32.vlgmr.msra.gmra.mrb[8].mxu1 %vm845_vm5, %v1019_v60  ;;  %2771 = vmatprep.subr.bf16.mxu1 %v3310_v11 }
 0x390   : > { %2772 = vmatpush3.bf16.msra.mxu1 %v3310_v11  ;;  %2775 = vmatprep.mubr.msk.bf16.mxu1 %vm684_vm1, %v3146_v61 }
 0x391   : > { %v928_v0 = vrot.slane %v927_v63, 2  ;;  %2773 = vmatprep.subr.bf16.mxu1 %v3338_v26 }
 0x393   : > { %v929_v3 = vmax.f32 %v927_v63, %v928_v0 }
 0x394   : > { %2774 = vmatpush3.bf16.msra.mxu1 %v3338_v26 }
 0x395   : > { %v930_v6 = vrot.slane %v929_v3, 1  ;;  %2856 = vmatprep.subr.bf16.mxu1 %v3170_v30 }
 0x397   : > { %v931_v7 = vmax.f32 %v929_v3, %v930_v6  ;;  %2776 = vmatmul.mubr.msk.bf16.vlgmr.msra.gmra.mrb[12].mxu1 %vm684_vm1, %v3147_v4  ;;  %v1844_v3 = vld [vmem:[%s4297_s16 + $0x58] sm:$0xff] }
 0x398   : > { %2858 = vmatpush3.bf16.msra.mxu1 %v3409_v5  ;;  %2791 = vmatprep.mubr.msk.f32.mxu1 %vm3171_vm0, %v3172_v31 }
 0x399   : > { %v932_v8 = vsub.f32 %v923_v55, %v931_v7  ;;  %2859 = vmatprep.subr.bf16.mxu1 %v3170_v30  ;;  %v1469_v55 = vsub.s32 3, %v3442_v51  ;;  %v1847_v51 = vld [vmem:[%s4297_s16 + $0x70] sm:$0xff] }
 0x39b   : > { %v933_v9 = vmul.f32 1.442695, %v932_v8  ;;  %v1480_v8 = vld [vmem:[%s4292_s11] sm:$0xff] }
 0x39d   : > { %3154 = vpow2.f32 %v933_v9  ;;  %v2897_v9 = vpack.c.bf16 %v1844_v3, %v1836_v2  ;;  %v1834_v3 = vld [vmem:[%s4297_s16 + $0x8] sm:$0xff] }
 0x3a7   : > { %v3155_v10 = vpop.eup %3154 }
 0x3a8   : > { %v935_v11 = vsel %vm924_vm6, %v3155_v10, 0.0 }
 0x3a9   : > { %v936_v12 = vrot.slane %v935_v11, 4 }
 0x3ab   : > { %v937_v13 = vadd.f32 %v936_v12, %v935_v11  ;;  %v1835_v12 = vld [vmem:[%s4297_s16 + $0x10] sm:$0xff] }
 0x3ad   : > { %v938_v14 = vrot.slane %v937_v13, 2 }
 0x3af   : > { %v939_v15 = vadd.f32 %v938_v14, %v937_v13  ;;  %v1843_v13 = vld [vmem:[%s4297_s16 + $0x50] sm:$0xff]  ;;  %v1852_v14 = vld [vmem:[%s4297_s16 + $0x98] sm:$0xff] }
 0x3b1   : > { %v940_v16 = vrot.slane %v939_v15, 1 }
 0x3b3   : > { %v941_v17 = vadd.f32 %v940_v16, %v939_v15  ;;  %v1860_v15 = vld [vmem:[%s4297_s16 + $0xd8] sm:$0xff]  ;;  %v1479_v16 = vld [vmem:[%s4287_s6] sm:$0xff] }
 0x3b5   : > { %3156 = vrcp.f32 %v941_v17  ;;  %v2899_v17 = vpack.c.bf16 %v1843_v13, %v1835_v12 }
 0x3bf   : > { %v3157_v18 = vpop.eup %3156 }
 0x3c0   : > { %v3418_v19 = vmul.f32 %v3157_v18, %v3155_v10  ;;  %v2901_v18 = vpack.c.bf16 %v1860_v15, %v1852_v14 }
 0x3c2   : > { %2792 = vmatmul.mubr.msk.f32.vlgmr.msra.gmra.mrb[10].mxu1 %vm1286_vm7, %v3418_v19 }
 0x3c3   : > { %2861 = vmatpush3.bf16.msra.mxu1 %v3409_v5  ;;  %2798 = vmatprep.mubr.msk.f32.mxu1 %vm3171_vm0, %v3172_v31 }
 0x3c4   : > { %2862 = vmatprep.subr.bf16.mxu1 %v3170_v30 }
 0x462   : > { %v1098_v24 = vpop.f32.mrb[8].mxu1 }
 0x463   : > { %v1099_v25 = vadd.f32 %v1098_v24, %v3384_v50  ;;  %v2770_v26 = vpop.f32.mrb[9].mxu1  ;;  %v1867_v24 = vld [vmem:[%s4297_s16 + $0x110] sm:$0xff] }
 0x464   : > { %v1884_v26 = vld [vmem:[%s4297_s16 + $0x198] sm:$0xff] }
 0x465   : > { %v1102_v27 = vmul.f32 0.029411765, %v1099_v25  ;;  %v1875_v25 = vld [vmem:[%s4297_s16 + $0x150] sm:$0xff] }
 0x467   : > { %v1103_v28 = vsel %vm924_vm6, %v1102_v27, -inf }
 0x468   : > { %v1104_v29 = vrot.slane %v1103_v28, 4 }
 0x46a   : > { %v1105_v30 = vmax.f32 %v1103_v28, %v1104_v29  ;;  %v2777_v32 = vpop.f32.mrb[12].mxu1  ;;  %v2907_v28 = vpack.c.bf16 %v1875_v25, %v1867_v24 }
 0x46b   : > { %v1188_v33 = vpop.f32.mrb[13].mxu1 }
 0x46c   : > { %v1106_v34 = vrot.slane %v1105_v30, 2  ;;  %v2778_v35 = vpop.f32.mrb[14].mxu1 }
 0x46d   : > { %v1191_v36 = vpop.f32.mrb[15].mxu1 }
 0x46e   : > { %v1107_v37 = vmax.f32 %v1105_v30, %v1106_v34  ;;  %v1883_v30 = vld [vmem:[%s4297_s16 + $0x190] sm:$0xff]  ;;  %v1908_v34 = vld [vmem:[%s4297_s16 + $0x258] sm:$0xff] }
 0x470   : > { %v1108_v38 = vrot.slane %v1107_v37, 1 }
 0x472   : > { %v1109_v39 = vmax.f32 %v1107_v37, %v1108_v38  ;;  %v1899_v37 = vld [vmem:[%s4297_s16 + $0x210] sm:$0xff] }
 0x473   : > { %v1907_v38 = vld [vmem:[%s4297_s16 + $0x250] sm:$0xff] }
 0x474   : > { %v1110_v40 = vsub.f32 %v1102_v27, %v1109_v39  ;;  %v1892_v27 = vld [vmem:[%s4297_s16 + $0x1d8] sm:$0xff] }
 0x475   : > { %v2909_v29 = vpack.c.bf16 %v1892_v27, %v1884_v26  ;;  %v1916_v39 = vld [vmem:[%s4297_s16 + $0x298] sm:$0xff] }
 0x476   : > { %v1111_v41 = vmul.f32 1.442695, %v1110_v40  ;;  %v1924_v40 = vld [vmem:[%s4297_s16 + $0x2d8] sm:$0xff] }
 0x478   : > { %3158 = vpow2.f32 %v1111_v41  ;;  %v2915_v41 = vpack.c.bf16 %v1907_v38, %v1899_v37  ;;  %v1874_v37 = vld [vmem:[%s4297_s16 + $0x148] sm:$0xff] }
 0x482   : > { %v3159_v42 = vpop.eup %3158 }
 0x483   : > { %v1113_v43 = vsel %vm924_vm6, %v3159_v42, 0.0 }
 0x484   : > { %v1114_v44 = vrot.slane %v1113_v43, 4 }
 0x486   : > { %v1115_v45 = vadd.f32 %v1114_v44, %v1113_v43  ;;  %v1915_v43 = vld [vmem:[%s4297_s16 + $0x290] sm:$0xff] }
 0x487   : > { %v1923_v44 = vld [vmem:[%s4297_s16 + $0x2d0] sm:$0xff] }
 0x488   : > { %v1116_v46 = vrot.slane %v1115_v45, 2 }
 0x48a   : > { %v1117_v47 = vadd.f32 %v1116_v46, %v1115_v45  ;;  %v2919_v45 = vpack.c.bf16 %v1923_v44, %v1915_v43  ;;  %v2785_v46 = vpop.f32.mrb[4].mxu0  ;;  %v1865_v44 = vld [vmem:[%s4297_s16 + $0x100] sm:$0xff] }
 0x48c   : > { %v1118_v49 = vrot.slane %v1117_v47, 1 }
 0x48e   : > { %v1119_v50 = vadd.f32 %v1118_v49, %v1117_v47  ;;  %v1269_v47 = vpop.f32.mrb[5].mxu0 }
 0x48f   : > { %v2786_v48 = vpop.f32.mrb[6].mxu0 }
 0x490   : > { %3160 = vrcp.f32 %v1119_v50  ;;  %v1272_v49 = vpop.f32.mrb[7].mxu0  ;;  %v1932_v50 = vld [vmem:[%s4297_s16 + $0x318] sm:$0xff] }
 0x495   : > { %v1356_v56 = vpop.f32.mrb[10].mxu1 }
 0x496   : > { %v1436_v57 = vrot.slane %v1356_v56, %v1435_v52  ;;  %v1446_v58 = vrot.slane %v1356_v56, %v1445_v53  ;;  %v1458_v59 = vrot.slane %v1356_v56, %v1457_v54  ;;  %v1470_v60 = vrot.slane %v1356_v56, %v1469_v55  ;;  %v2793_v61 = vpop.f32.mrb[11].mxu1  ;;  %v1940_v56 = vld [vmem:[%s4297_s16 + $0x358] sm:$0xff] }
 0x497   : > { %v1948_v61 = vld [vmem:[%s4297_s16 + $0x398] sm:$0xff] }
 0x498   : > { %v1437_v62 = vmul.f32 %v1436_v57, %v1188_v33  ;;  %v1447_v63 = vmul.f32 %v1446_v58, %v1191_v36  ;;  %v1459_v0 = vmul.f32 %v2777_v32, %v1458_v59  ;;  %v1471_v1 = vmul.f32 %v2778_v35, %v1470_v60  ;;  %v1891_v32 = vld [vmem:[%s4297_s16 + $0x1d0] sm:$0xff]  ;;  %v1900_v33 = vld [vmem:[%s4297_s16 + $0x218] sm:$0xff] }
 0x499   : > { %v2911_v35 = vpack.c.bf16 %v1891_v32, %v1883_v30  ;;  %v2913_v36 = vpack.c.bf16 %v1908_v34, %v1900_v33  ;;  %v2921_v57 = vpack.c.bf16 %v1940_v56, %v1932_v50  ;;  %v1931_v58 = vld [vmem:[%s4297_s16 + $0x310] sm:$0xff]  ;;  %v1890_v50 = vld [vmem:[%s4297_s16 + $0x1c8] sm:$0xff]  ;;  %v1888_v56 = vld [vmem:[%s4297_s16 + $0x1b8] sm:$0xff] }
 0x49a   : > { %v3161_v4 = vpop.eup %3160  ;;  %v1448_v6 = vadd.f32 %v1447_v63, %v1437_v62  ;;  %v1939_v59 = vld [vmem:[%s4297_s16 + $0x350] sm:$0xff]  ;;  %v1956_v62 = vld [vmem:[%s4297_s16 + $0x3d8] sm:$0xff] }
 0x49b   : > { %v1121_v7 = vmul.f32 %v3161_v4, %v3159_v42  ;;  %v2917_v42 = vpack.c.bf16 %v1924_v40, %v1916_v39  ;;  %v2923_v60 = vpack.c.bf16 %v1939_v59, %v1931_v58  ;;  %v2925_v63 = vpack.c.bf16 %v1956_v62, %v1948_v61  ;;  %v1842_v4 = vld [vmem:[%s4297_s16 + $0x48] sm:$0xff]  ;;  %v1855_v30 = vld [vmem:[%s4297_s16 + $0xb0] sm:$0xff]  ;;  %v1872_v39 = vld [vmem:[%s4297_s16 + $0x138] sm:$0xff] }
 0x49c   : > { %v1460_v10 = vadd.f32 %v1459_v0, %v1448_v6  ;;  %v1947_v0 = vld [vmem:[%s4297_s16 + $0x390] sm:$0xff]  ;;  %v2865_v6 = vpack.c.bf16 %v1842_v4, %v1834_v3  ;;  %v1880_v40 = vld [vmem:[%s4297_s16 + $0x178] sm:$0xff]  ;;  %v1881_v61 = vld [vmem:[%s4297_s16 + $0x180] sm:$0xff] }
 0x49d   : > { %2799 = vmatmul.mubr.msk.f32.vlgmr.msra.gmra.mrb[16].mxu1 %vm1286_vm7, %v1121_v7  ;;  %2802 = vmatpush3.msk.msra.mxu0 %vm763_vm2, %v1121_v7  ;;  %v1840_v7 = vld [vmem:[%s4297_s16 + $0x38] sm:$0xff]  ;;  %v1889_v62 = vld [vmem:[%s4297_s16 + $0x1c0] sm:$0xff]  ;;  %v1906_v3 = vld [vmem:[%s4297_s16 + $0x248] sm:$0xff] }
 0x49e   : > { %2804 = vmatmul.mubr.msk.f32.vlgmr.msra.gmra.mrb[8].mxu0 %vm759_vm3, %v1480_v8  ;;  %2806 = vmatprep.subr.mxu0 %v3172_v31  ;;  %v3469_v11 = vadd.f32 %v1471_v1, %v1460_v10  ;;  %v1955_v1 = vld [vmem:[%s4297_s16 + $0x3d0] sm:$0xff]  ;;  %v1848_v8 = vld [vmem:[%s4297_s16 + $0x78] sm:$0xff] }
 0x49f   : > { %2807 = vmatpush3.msk.msra.mxu0 %vm763_vm2, %v3418_v19  ;;  %2808 = vmatprep.mubr.msk.f32.mxu0 %vm3171_vm0, %v3172_v31  ;;  %v1859_v19 = vld [vmem:[%s4297_s16 + $0xd0] sm:$0xff]  ;;  %v2927_v2 = vpack.c.bf16 %v1955_v1, %v1947_v0  ;;  %v1904_v4 = vld [vmem:[%s4297_s16 + $0x238] sm:$0xff] }
 0x4a0   : > { %2898 = vmatprep.subr.bf16.mxu0 %v2897_v9  ;;  %2864 = vmatpush3.bf16.msra.mxu1 %v3409_v5  ;;  %v1851_v5 = vld [vmem:[%s4297_s16 + $0x90] sm:$0xff]  ;;  %v2961_v9 = vpack.c.bf16 %v1848_v8, %v1840_v7  ;;  %v2879_v7 = vpack.c.bf16 %v1889_v62, %v1881_v61  ;;  %v1845_v61 = vld [vmem:[%s4297_s16 + $0x60] sm:$0xff]  ;;  %v1854_v62 = vld [vmem:[%s4297_s16 + $0xa8] sm:$0xff] }
 0x4a1   : > { %2815 = vmatprep.mubr.msk.f32.mxu1 %vm3171_vm0, %v3172_v31  ;;  %v2903_v22 = vpack.c.bf16 %v1859_v19, %v1851_v5  ;;  %2866 = vmatprep.subr.bf16.mxu1 %v2865_v6  ;;  %v1895_v1 = vld [vmem:[%s4297_s16 + $0x1f0] sm:$0xff]  ;;  %v1912_v6 = vld [vmem:[%s4297_s16 + $0x278] sm:$0xff] }
 0x4a6   : > { %2809 = vmatmul.mubr.msk.f32.vlgmr.msra.gmra.mrb[8].mxu0 %vm759_vm3, %v1479_v16 }
 0x4a7   : > { %2900 = vmatpush1.bf16.msra.mxu0 %v2899_v17  ;;  %2096 = vmatprep.mubr.f32.mxu0 %v3172_v31 }
 0x4a8   : > { %2902 = vmatprep.subr.bf16.mxu0 %v2901_v18 }
 0x4ab   : > { %2904 = vmatpush1.bf16.msra.mxu0 %v2903_v22  ;;  %v1856_v22 = vld [vmem:[%s4297_s16 + $0xb8] sm:$0xff] }
 0x4ac   : > { %2906 = vmatprep.subr.bf16.mxu0 %v2905_v23  ;;  %v1864_v23 = vld [vmem:[%s4297_s16 + $0xf8] sm:$0xff] }
 0x4ad   : > { %v2965_v34 = vpack.c.bf16 %v1864_v23, %v1856_v22  ;;  %v1930_v22 = vld [vmem:[%s4297_s16 + $0x308] sm:$0xff] }
 0x4ae   : > { %v1938_v23 = vld [vmem:[%s4297_s16 + $0x348] sm:$0xff] }
 0x4af   : > { %2908 = vmatpush1.bf16.msra.mxu0 %v2907_v28  ;;  %v1849_v28 = vld [vmem:[%s4297_s16 + $0x80] sm:$0xff] }
 0x4b0   : > { %2910 = vmatprep.subr.bf16.mxu0 %v2909_v29  ;;  %v1857_v29 = vld [vmem:[%s4297_s16 + $0xc0] sm:$0xff] }
 0x4b3   : > { %2912 = vmatpush1.bf16.msra.mxu0 %v2911_v35  ;;  %v1863_v35 = vld [vmem:[%s4297_s16 + $0xf0] sm:$0xff] }
 0x4b4   : > { %2914 = vmatprep.subr.bf16.mxu0 %v2913_v36  ;;  %v1866_v36 = vld [vmem:[%s4297_s16 + $0x108] sm:$0xff] }
 0x4b5   : > { %v2873_v43 = vpack.c.bf16 %v1874_v37, %v1866_v36  ;;  %v1946_v36 = vld [vmem:[%s4297_s16 + $0x388] sm:$0xff] }
 0x4b6   : > { %v1954_v37 = vld [vmem:[%s4297_s16 + $0x3c8] sm:$0xff] }
 0x4b7   : > { %2916 = vmatpush1.bf16.msra.mxu0 %v2915_v41  ;;  %v2871_v41 = vpack.c.bf16 %v1857_v29, %v1849_v28  ;;  %v2889_v28 = vpack.c.bf16 %v1938_v23, %v1930_v22  ;;  %v1929_v29 = vld [vmem:[%s4297_s16 + $0x300] sm:$0xff]  ;;  %v1747_v22 = vld [vmem:[%s4296_s15 + $0x150] sm:$0xff] }
 0x4b8   : > { %2918 = vmatprep.subr.bf16.mxu0 %v2917_v42  ;;  %v2967_v42 = vpack.c.bf16 %v1863_v35, %v1855_v30  ;;  %v1937_v30 = vld [vmem:[%s4297_s16 + $0x340] sm:$0xff]  ;;  %v1943_v35 = vld [vmem:[%s4297_s16 + $0x370] sm:$0xff] }
 0x4bb   : > { %2920 = vmatpush1.bf16.msra.mxu0 %v2919_v45  ;;  %v1873_v45 = vld [vmem:[%s4297_s16 + $0x140] sm:$0xff] }
 0x4bc   : > { %2922 = vmatprep.subr.bf16.mxu0 %v2921_v57  ;;  %v1896_v57 = vld [vmem:[%s4297_s16 + $0x1f8] sm:$0xff]  ;;  %v2875_v58 = vpack.c.bf16 %v1873_v45, %v1865_v44  ;;  %v1953_v44 = vld [vmem:[%s4297_s16 + $0x3c0] sm:$0xff]  ;;  %v1951_v45 = vld [vmem:[%s4297_s16 + $0x3b0] sm:$0xff] }
 0x4bd   : > { %v2973_v0 = vpack.c.bf16 %v1896_v57, %v1888_v56  ;;  %v1716_v56 = vld [vmem:[%s4296_s15 + $0x58] sm:$0xff] }
 0x4bf   : > { %2924 = vmatpush1.bf16.msra.mxu0 %v2923_v60 }
 0x4c0   : > { %2926 = vmatprep.subr.bf16.mxu0 %v2925_v63  ;;  %v1887_v63 = vld [vmem:[%s4297_s16 + $0x1b0] sm:$0xff] }
 0x4c1   : > { %v2975_v8 = vpack.c.bf16 %v1895_v1, %v1887_v63  ;;  %v1862_v63 = vld [vmem:[%s4297_s16 + $0xe8] sm:$0xff]  ;;  %v1707_v1 = vld [vmem:[%s4296_s15 + $0x10] sm:$0xff] }
 0x4c3   : > { %2928 = vmatpush1.bf16.msra.mxu0 %v2927_v2  ;;  %v1898_v2 = vld [vmem:[%s4297_s16 + $0x208] sm:$0xff] }
 0x4c4   : > { %2962 = vmatprep.subr.bf16.mxu0 %v2961_v9  ;;  %v2881_v9 = vpack.c.bf16 %v1906_v3, %v1898_v2  ;;  %v1715_v2 = vld [vmem:[%s4296_s15 + $0x50] sm:$0xff] }
 0x570   : > { %v1429_v10 = vpop.f32.mrb[16].mxu1 }
 0x571   : > { %v1441_v12 = vrot.slane %v1429_v10, %v1435_v52  ;;  %v1452_v13 = vrot.slane %v1429_v10, %v1445_v53  ;;  %v1464_v14 = vrot.slane %v1429_v10, %v1457_v54  ;;  %v1476_v15 = vrot.slane %v1429_v10, %v1469_v55  ;;  %v2800_v16 = vpop.f32.mrb[17].mxu1  ;;  %v1841_v52 = vld [vmem:[%s4297_s16 + $0x40] sm:$0xff]  ;;  %v1839_v53 = vld [vmem:[%s4297_s16 + $0x30] sm:$0xff]  ;;  %v1850_v55 = vld [vmem:[%s4297_s16 + $0x88] sm:$0xff] }
 0x572   : > { %v2867_v24 = vpack.c.bf16 %v1841_v52, %v1833_v20  ;;  %v2963_v26 = vpack.c.bf16 %v1847_v51, %v1839_v53  ;;  %v2869_v27 = vpack.c.bf16 %v1858_v21, %v1850_v55  ;;  %v1897_v10 = vld [vmem:[%s4297_s16 + $0x200] sm:$0xff]  ;;  %v1914_v16 = vld [vmem:[%s4297_s16 + $0x288] sm:$0xff]  ;;  %v1919_v51 = vld [vmem:[%s4297_s16 + $0x2b0] sm:$0xff] }
 0x573   : > { %v1442_v17 = vmul.f32 %v1441_v12, %v1269_v47  ;;  %v1453_v18 = vmul.f32 %v1452_v13, %v1272_v49  ;;  %v1465_v5 = vmul.f32 %v2785_v46, %v1464_v14  ;;  %v1477_v19 = vmul.f32 %v2786_v48, %v1476_v15  ;;  %v1871_v46 = vld [vmem:[%s4297_s16 + $0x130] sm:$0xff]  ;;  %v1882_v49 = vld [vmem:[%s4297_s16 + $0x188] sm:$0xff]  ;;  %v1905_v12 = vld [vmem:[%s4297_s16 + $0x240] sm:$0xff] }
 0x574   : > { %v2969_v47 = vpack.c.bf16 %v1880_v40, %v1872_v39  ;;  %v1879_v48 = vld [vmem:[%s4297_s16 + $0x170] sm:$0xff]  ;;  %v2877_v60 = vpack.c.bf16 %v1890_v50, %v1882_v49  ;;  %v2977_v14 = vpack.c.bf16 %v1912_v6, %v1904_v4  ;;  %v1913_v53 = vld [vmem:[%s4297_s16 + $0x280] sm:$0xff]  ;;  %v1960_v39 = vld [vmem:[%s4297_s16 + $0x3f8] sm:$0xff]  ;;  %v2891_v40 = vpack.c.bf16 %v1937_v30, %v1929_v29 }
 0x575   : > { %v1454_v54 = vadd.f32 %v1453_v18, %v1442_v17  ;;  %v2971_v59 = vpack.c.bf16 %v1879_v48, %v1871_v46  ;;  %v1903_v13 = vld [vmem:[%s4297_s16 + $0x230] sm:$0xff]  ;;  %v1922_v17 = vld [vmem:[%s4297_s16 + $0x2c8] sm:$0xff]  ;;  %v1920_v18 = vld [vmem:[%s4297_s16 + $0x2b8] sm:$0xff] }
 0x576   : > { %v1911_v15 = vld [vmem:[%s4297_s16 + $0x270] sm:$0xff]  ;;  %v2885_v52 = vpack.c.bf16 %v1922_v17, %v1914_v16  ;;  %v1838_v48 = vld [vmem:[%s4297_s16 + $0x28] sm:$0xff]  ;;  %v1708_v50 = vld [vmem:[%s4296_s15 + $0x18] sm:$0xff] }
 0x577   : > { %v1466_v25 = vadd.f32 %v1465_v5, %v1454_v54  ;;  %v1928_v5 = vld [vmem:[%s4297_s16 + $0x2f8] sm:$0xff]  ;;  %v2979_v20 = vpack.c.bf16 %v1911_v15, %v1903_v13  ;;  %v1921_v54 = vld [vmem:[%s4297_s16 + $0x2c0] sm:$0xff]  ;;  %v1927_v21 = vld [vmem:[%s4297_s16 + $0x2f0] sm:$0xff]  ;;  %v3027_v13 = vpack.c.bf16 %v1715_v2, %v1707_v1 }
 0x578   : > { %v2981_v55 = vpack.c.bf16 %v1928_v5, %v1920_v18  ;;  %v1846_v49 = vld [vmem:[%s4297_s16 + $0x68] sm:$0xff]  ;;  %v1724_v4 = vld [vmem:[%s4296_s15 + $0x98] sm:$0xff]  ;;  %v1723_v15 = vld [vmem:[%s4296_s15 + $0x90] sm:$0xff] }
 0x579   : > { %v1627_v32 = vpop.f32.mrb[8].mxu0  ;;  %v3626_v33 = vadd.f32 %v1477_v19, %v1466_v25  ;;  %v2883_v19 = vpack.c.bf16 %v1905_v12, %v1897_v10  ;;  %v1944_v25 = vld [vmem:[%s4297_s16 + $0x378] sm:$0xff]  ;;  %v1870_v10 = vld [vmem:[%s4297_s16 + $0x128] sm:$0xff]  ;;  %v1731_v16 = vld [vmem:[%s4296_s15 + $0xd0] sm:$0xff] }
 0x57a   : > { %v2810_v38 = vpop.f32.mrb[9].mxu0  ;;  %2816 = vmatmul.mubr.msk.f32.vlgmr.msra.gmra.mrb[18].mxu1 %vm1286_vm7, %v1627_v32  ;;  %v1935_v32 = vld [vmem:[%s4297_s16 + $0x330] sm:$0xff]  ;;  %v1732_v6 = vld [vmem:[%s4296_s15 + $0xd8] sm:$0xff]  ;;  %v1878_v12 = vld [vmem:[%s4297_s16 + $0x168] sm:$0xff] }
 0x57b   : > { %2868 = vmatpush1.bf16.msra.mxu1 %v2867_v24  ;;  %2097 = vmatmul.mubr.f32.vlgmr.msra.gmra.mrb[10].mxu0 %v3626_v33  ;;  %v1936_v24 = vld [vmem:[%s4297_s16 + $0x338] sm:$0xff]  ;;  %v1902_v29 = vld [vmem:[%s4297_s16 + $0x228] sm:$0xff]  ;;  %v1795_v1 = vld [vmem:[%s4296_s15 + $0x2d0] sm:$0xff] }
 0x57c   : > { %2964 = vmatpush1.bf16.msra.mxu0 %v2963_v26  ;;  %2870 = vmatprep.subr.bf16.mxu1 %v2869_v27  ;;  %v2887_v26 = vpack.c.bf16 %v1921_v54, %v1913_v53  ;;  %v2983_v27 = vpack.c.bf16 %v1927_v21, %v1919_v51  ;;  %v1952_v38 = vld [vmem:[%s4297_s16 + $0x3b8] sm:$0xff]  ;;  %v1886_v53 = vld [vmem:[%s4297_s16 + $0x1a8] sm:$0xff]  ;;  %v3031_v51 = vpack.c.bf16 %v1731_v16, %v1723_v15  ;;  %v1739_v21 = vld [vmem:[%s4296_s15 + $0x110] sm:$0xff] }
 0x57d   : > { %2966 = vmatprep.subr.bf16.mxu0 %v2965_v34  ;;  %2025 = vmatprep.mubr.f32.mxu1 %v3172_v31  ;;  %v2985_v34 = vpack.c.bf16 %v1944_v25, %v1936_v24  ;;  %v2989_v46 = vpack.c.bf16 %v1960_v39, %v1952_v38  ;;  %v1740_v18 = vld [vmem:[%s4296_s15 + $0x118] sm:$0xff]  ;;  %v1894_v54 = vld [vmem:[%s4297_s16 + $0x1e8] sm:$0xff]  ;;  %v1811_v15 = vld [vmem:[%s4296_s15 + $0x350] sm:$0xff] }
 0x57e   : > { %2238 = vmatprep.mubr.f32.mxu0 %v3172_v31  ;;  %v1748_v5 = vld [vmem:[%s4296_s15 + $0x158] sm:$0xff]  ;;  %v1910_v30 = vld [vmem:[%s4297_s16 + $0x268] sm:$0xff] }
 0x57f   : > { %2872 = vmatpush1.bf16.msra.mxu1 %v2871_v41  ;;  %v2987_v41 = vpack.c.bf16 %v1943_v35, %v1935_v32  ;;  %v1756_v24 = vld [vmem:[%s4296_s15 + $0x198] sm:$0xff]  ;;  %v3035_v32 = vpack.c.bf16 %v1747_v22, %v1739_v21  ;;  %v1755_v35 = vld [vmem:[%s4296_s15 + $0x190] sm:$0xff] }
 0x580   : > { %2968 = vmatpush1.bf16.msra.mxu0 %v2967_v42  ;;  %2874 = vmatprep.subr.bf16.mxu1 %v2873_v43  ;;  %v2893_v42 = vpack.c.bf16 %v1954_v37, %v1946_v36  ;;  %v1945_v43 = vld [vmem:[%s4297_s16 + $0x380] sm:$0xff]  ;;  %v1764_v25 = vld [vmem:[%s4296_s15 + $0x1d8] sm:$0xff]  ;;  %v1763_v36 = vld [vmem:[%s4296_s15 + $0x1d0] sm:$0xff] }
 0x581   : > { %2970 = vmatprep.subr.bf16.mxu0 %v2969_v47  ;;  %v1959_v47 = vld [vmem:[%s4297_s16 + $0x3f0] sm:$0xff]  ;;  %v2895_v57 = vpack.c.bf16 %v1953_v44, %v1945_v43  ;;  %v1772_v38 = vld [vmem:[%s4296_s15 + $0x218] sm:$0xff]  ;;  %v1918_v43 = vld [vmem:[%s4297_s16 + $0x2a8] sm:$0xff] }
 0x582   : > { %v1780_v39 = vld [vmem:[%s4296_s15 + $0x258] sm:$0xff]  ;;  %v1926_v44 = vld [vmem:[%s4297_s16 + $0x2e8] sm:$0xff]  ;;  %v1827_v21 = vld [vmem:[%s4296_s15 + $0x3d0] sm:$0xff] }
 0x583   : > { %2876 = vmatpush1.bf16.msra.mxu1 %v2875_v58  ;;  %v2991_v58 = vpack.c.bf16 %v1959_v47, %v1951_v45  ;;  %v3039_v45 = vpack.c.bf16 %v1763_v36, %v1755_v35  ;;  %v1771_v47 = vld [vmem:[%s4296_s15 + $0x210] sm:$0xff]  ;;  %v1738_v35 = vld [vmem:[%s4296_s15 + $0x108] sm:$0xff] }
 0x584   : > { %2972 = vmatpush1.bf16.msra.mxu0 %v2971_v59  ;;  %2878 = vmatprep.subr.bf16.mxu1 %v2877_v60  ;;  %v2929_v59 = vpack.c.bf16 %v1846_v49, %v1838_v48  ;;  %v1837_v60 = vld [vmem:[%s4297_s16 + $0x20] sm:$0xff]  ;;  %v1779_v48 = vld [vmem:[%s4296_s15 + $0x250] sm:$0xff]  ;;  %v1746_v36 = vld [vmem:[%s4296_s15 + $0x148] sm:$0xff] }
 0x585   : > { %2974 = vmatprep.subr.bf16.mxu0 %v2973_v0  ;;  %v3025_v0 = vpack.c.bf16 %v1716_v56, %v1708_v50  ;;  %v2931_v3 = vpack.c.bf16 %v1845_v61, %v1837_v60  ;;  %v1788_v50 = vld [vmem:[%s4296_s15 + $0x298] sm:$0xff]  ;;  %v1934_v60 = vld [vmem:[%s4297_s16 + $0x328] sm:$0xff] }
 0x586   : > { %v1796_v56 = vld [vmem:[%s4296_s15 + $0x2d8] sm:$0xff]  ;;  %v1942_v61 = vld [vmem:[%s4297_s16 + $0x368] sm:$0xff] }
 0x587   : > { %2880 = vmatpush1.bf16.msra.mxu1 %v2879_v7  ;;  %v2933_v7 = vpack.c.bf16 %v1862_v63, %v1854_v62  ;;  %v3043_v62 = vpack.c.bf16 %v1779_v48, %v1771_v47  ;;  %v3045_v63 = vpack.c.bf16 %v1796_v56, %v1788_v50  ;;  %v1778_v47 = vld [vmem:[%s4296_s15 + $0x248] sm:$0xff]  ;;  %v1769_v50 = vld [vmem:[%s4296_s15 + $0x200] sm:$0xff] }
 0x588   : > { %2976 = vmatpush1.bf16.msra.mxu0 %v2975_v8  ;;  %2882 = vmatprep.subr.bf16.mxu1 %v2881_v9  ;;  %v1853_v8 = vld [vmem:[%s4297_s16 + $0xa0] sm:$0xff] }
 0x589   : > { %2978 = vmatprep.subr.bf16.mxu0 %v2977_v14  ;;  %v1861_v9 = vld [vmem:[%s4297_s16 + $0xe0] sm:$0xff]  ;;  %v3029_v14 = vpack.c.bf16 %v1732_v6, %v1724_v4  ;;  %v1812_v4 = vld [vmem:[%s4296_s15 + $0x358] sm:$0xff]  ;;  %v2953_v6 = vpack.c.bf16 %v1942_v61, %v1934_v60 }
 0x58a   : > { %v2935_v17 = vpack.c.bf16 %v1861_v9, %v1853_v8  ;;  %v1941_v8 = vld [vmem:[%s4297_s16 + $0x360] sm:$0xff]  ;;  %v1950_v9 = vld [vmem:[%s4297_s16 + $0x3a8] sm:$0xff] }
 0x58b   : > { %2884 = vmatpush1.bf16.msra.mxu1 %v2883_v19  ;;  %v2937_v19 = vpack.c.bf16 %v1878_v12, %v1870_v10  ;;  %v1958_v10 = vld [vmem:[%s4297_s16 + $0x3e8] sm:$0xff]  ;;  %v1777_v56 = vld [vmem:[%s4296_s15 + $0x240] sm:$0xff] }
 0x58c   : > { %2980 = vmatpush1.bf16.msra.mxu0 %v2979_v20  ;;  %2886 = vmatprep.subr.bf16.mxu1 %v2885_v52  ;;  %v1869_v20 = vld [vmem:[%s4297_s16 + $0x120] sm:$0xff] }
 0x58d   : > { %2982 = vmatprep.subr.bf16.mxu0 %v2981_v55  ;;  %v1877_v52 = vld [vmem:[%s4297_s16 + $0x160] sm:$0xff]  ;;  %v3033_v55 = vpack.c.bf16 %v1748_v5, %v1740_v18  ;;  %v1828_v18 = vld [vmem:[%s4296_s15 + $0x3d8] sm:$0xff]  ;;  %v2957_v5 = vpack.c.bf16 %v1958_v10, %v1950_v9 }
 0x58e   : > { %v2939_v23 = vpack.c.bf16 %v1877_v52, %v1869_v20  ;;  %v1957_v20 = vld [vmem:[%s4297_s16 + $0x3e0] sm:$0xff]  ;;  %v1706_v52 = vld [vmem:[%s4296_s15 + $0x8] sm:$0xff]  ;;  %v1720_v9 = vld [vmem:[%s4296_s15 + $0x78] sm:$0xff] }
 0x58f   : > { %2888 = vmatpush1.bf16.msra.mxu1 %v2887_v26  ;;  %v2941_v26 = vpack.c.bf16 %v1894_v54, %v1886_v53  ;;  %v1714_v53 = vld [vmem:[%s4296_s15 + $0x48] sm:$0xff]  ;;  %v1785_v61 = vld [vmem:[%s4296_s15 + $0x280] sm:$0xff] }
 0x590   : > { %2984 = vmatpush1.bf16.msra.mxu0 %v2983_v27  ;;  %2890 = vmatprep.subr.bf16.mxu1 %v2889_v28  ;;  %v1885_v27 = vld [vmem:[%s4297_s16 + $0x1a0] sm:$0xff] }
 0x591   : > { %2986 = vmatprep.subr.bf16.mxu0 %v2985_v34  ;;  %v1893_v28 = vld [vmem:[%s4297_s16 + $0x1e0] sm:$0xff]  ;;  %v3037_v34 = vpack.c.bf16 %v1764_v25, %v1756_v24 }
 0x592   : > { %v2943_v37 = vpack.c.bf16 %v1893_v28, %v1885_v27  ;;  %v1705_v24 = vld [vmem:[%s4296_s15] sm:$0xff]  ;;  %v1730_v27 = vld [vmem:[%s4296_s15 + $0xc8] sm:$0xff] }
 0x593   : > { %2892 = vmatpush1.bf16.msra.mxu1 %v2891_v40  ;;  %v2945_v40 = vpack.c.bf16 %v1910_v30, %v1902_v29  ;;  %v1713_v25 = vld [vmem:[%s4296_s15 + $0x40] sm:$0xff] }
 0x594   : > { %2988 = vmatpush1.bf16.msra.mxu0 %v2987_v41  ;;  %2894 = vmatprep.subr.bf16.mxu1 %v2893_v42  ;;  %v1901_v41 = vld [vmem:[%s4297_s16 + $0x220] sm:$0xff]  ;;  %v2995_v29 = vpack.c.bf16 %v1713_v25, %v1705_v24 }
 0x595   : > { %2990 = vmatprep.subr.bf16.mxu0 %v2989_v46  ;;  %v1909_v42 = vld [vmem:[%s4297_s16 + $0x260] sm:$0xff]  ;;  %v3041_v46 = vpack.c.bf16 %v1780_v39, %v1772_v38  ;;  %v3001_v38 = vpack.c.bf16 %v1746_v36, %v1738_v35  ;;  %v1742_v35 = vld [vmem:[%s4296_s15 + $0x128] sm:$0xff]  ;;  %v1744_v36 = vld [vmem:[%s4296_s15 + $0x138] sm:$0xff] }
 0x596   : > { %v2947_v49 = vpack.c.bf16 %v1909_v42, %v1901_v41  ;;  %v1737_v39 = vld [vmem:[%s4296_s15 + $0x100] sm:$0xff]  ;;  %v1754_v41 = vld [vmem:[%s4296_s15 + $0x188] sm:$0xff] }
 0x597   : > { %2896 = vmatpush1.bf16.msra.mxu1 %v2895_v57  ;;  %v2949_v57 = vpack.c.bf16 %v1926_v44, %v1918_v43  ;;  %v1753_v44 = vld [vmem:[%s4296_s15 + $0x180] sm:$0xff] }
 0x598   : > { %2992 = vmatpush1.bf16.msra.mxu0 %v2991_v58  ;;  %2930 = vmatprep.subr.bf16.mxu1 %v2929_v59  ;;  %v1917_v58 = vld [vmem:[%s4297_s16 + $0x2a0] sm:$0xff] }
 0x599   : > { %3026 = vmatprep.subr.bf16.mxu0 %v3025_v0  ;;  %v1925_v59 = vld [vmem:[%s4297_s16 + $0x2e0] sm:$0xff]  ;;  %v1787_v0 = vld [vmem:[%s4296_s15 + $0x290] sm:$0xff] }
 0x59a   : > { %2026 = vmatmul.mubr.f32.vlgmr.msra.gmra.mrb[20].mxu1 %v3626_v33  ;;  %v2951_v2 = vpack.c.bf16 %v1925_v59, %v1917_v58  ;;  %v3047_v12 = vpack.c.bf16 %v1795_v1, %v1787_v0  ;;  %v1794_v58 = vld [vmem:[%s4296_s15 + $0x2c8] sm:$0xff]  ;;  %v3011_v59 = vpack.c.bf16 %v1777_v56, %v1769_v50  ;;  %v1725_v25 = vld [vmem:[%s4296_s15 + $0xa0] sm:$0xff] }
 0x59b   : > { %2932 = vmatpush1.bf16.msra.mxu1 %v2931_v3  ;;  %2239 = vmatmul.mubr.f32.vlgmr.msra.gmra.mrb[12].mxu0 %v3626_v33  ;;  %v1804_v3 = vld [vmem:[%s4296_s15 + $0x318] sm:$0xff]  ;;  %v1810_v0 = vld [vmem:[%s4296_s15 + $0x348] sm:$0xff]  ;;  %v1757_v56 = vld [vmem:[%s4296_s15 + $0x1a0] sm:$0xff] }
 0x59c   : > { %2934 = vmatprep.subr.bf16.mxu1 %v2933_v7  ;;  %2167 = vmatprep.mubr.f32.mxu1 %v3172_v31  ;;  %v1933_v7 = vld [vmem:[%s4297_s16 + $0x320] sm:$0xff] }
 0x59d   : > { %3028 = vmatpush1.bf16.msra.mxu0 %v3027_v13  ;;  %2380 = vmatprep.mubr.f32.mxu0 %v3172_v31  ;;  %v3049_v13 = vpack.c.bf16 %v1812_v4, %v1804_v3  ;;  %v2955_v16 = vpack.c.bf16 %v1941_v8, %v1933_v7  ;;  %v1801_v3 = vld [vmem:[%s4296_s15 + $0x300] sm:$0xff]  ;;  %v1826_v7 = vld [vmem:[%s4296_s15 + $0x3c8] sm:$0xff]  ;;  %v1712_v8 = vld [vmem:[%s4296_s15 + $0x38] sm:$0xff] }
 0x59e   : > { %3030 = vmatprep.subr.bf16.mxu0 %v3029_v14  ;;  %v1803_v14 = vld [vmem:[%s4296_s15 + $0x310] sm:$0xff]  ;;  %v1809_v4 = vld [vmem:[%s4296_s15 + $0x340] sm:$0xff] }
 0x59f   : > { %2936 = vmatpush1.bf16.msra.mxu1 %v2935_v17  ;;  %v1820_v17 = vld [vmem:[%s4296_s15 + $0x398] sm:$0xff]  ;;  %v3051_v54 = vpack.c.bf16 %v1811_v15, %v1803_v14  ;;  %v3019_v10 = vpack.c.bf16 %v1809_v4, %v1801_v3  ;;  %v1817_v14 = vld [vmem:[%s4296_s15 + $0x380] sm:$0xff] }
 0x5a0   : > { %2938 = vmatprep.subr.bf16.mxu1 %v2937_v19  ;;  %v1949_v19 = vld [vmem:[%s4297_s16 + $0x3a0] sm:$0xff] }
 0x5a1   : > { %3032 = vmatpush1.bf16.msra.mxu0 %v3031_v51  ;;  %v3053_v51 = vpack.c.bf16 %v1828_v18, %v1820_v17  ;;  %v2959_v22 = vpack.c.bf16 %v1957_v20, %v1949_v19  ;;  %v1825_v15 = vld [vmem:[%s4296_s15 + $0x3c0] sm:$0xff]  ;;  %v1718_v17 = vld [vmem:[%s4296_s15 + $0x68] sm:$0xff] }
 0x5a2   : > { %3034 = vmatprep.subr.bf16.mxu0 %v3033_v55  ;;  %v1819_v55 = vld [vmem:[%s4296_s15 + $0x390] sm:$0xff]  ;;  %v3023_v18 = vpack.c.bf16 %v1825_v15, %v1817_v14  ;;  %v1709_v19 = vld [vmem:[%s4296_s15 + $0x20] sm:$0xff]  ;;  %v1800_v14 = vld [vmem:[%s4296_s15 + $0x2f8] sm:$0xff] }
 0x5a3   : > { %2940 = vmatpush1.bf16.msra.mxu1 %v2939_v23  ;;  %v2993_v23 = vpack.c.bf16 %v1714_v53, %v1706_v52  ;;  %v3055_v28 = vpack.c.bf16 %v1827_v21, %v1819_v55  ;;  %v1717_v20 = vld [vmem:[%s4296_s15 + $0x60] sm:$0xff]  ;;  %v1711_v52 = vld [vmem:[%s4296_s15 + $0x30] sm:$0xff]  ;;  %v1728_v55 = vld [vmem:[%s4296_s15 + $0xb8] sm:$0xff] }
 0x5a4   : > { %2942 = vmatprep.subr.bf16.mxu1 %v2941_v26  ;;  %v1722_v26 = vld [vmem:[%s4296_s15 + $0x88] sm:$0xff]  ;;  %v1719_v53 = vld [vmem:[%s4296_s15 + $0x70] sm:$0xff]  ;;  %v1736_v21 = vld [vmem:[%s4296_s15 + $0xf8] sm:$0xff] }
 0x5a5   : > { %3036 = vmatpush1.bf16.msra.mxu0 %v3035_v32  ;;  %v2997_v30 = vpack.c.bf16 %v1730_v27, %v1722_v26  ;;  %v1721_v32 = vld [vmem:[%s4296_s15 + $0x80] sm:$0xff]  ;;  %v3091_v24 = vpack.c.bf16 %v1719_v53, %v1711_v52  ;;  %v1799_v52 = vld [vmem:[%s4296_s15 + $0x2f0] sm:$0xff]  ;;  %v1806_v53 = vld [vmem:[%s4296_s15 + $0x328] sm:$0xff] }
 0x5a6   : > { %3038 = vmatprep.subr.bf16.mxu0 %v3037_v34  ;;  %v1729_v34 = vld [vmem:[%s4296_s15 + $0xc0] sm:$0xff] }
 0x5a7   : > { %2944 = vmatpush1.bf16.msra.mxu1 %v2943_v37  ;;  %v2999_v37 = vpack.c.bf16 %v1729_v34, %v1721_v32  ;;  %v1733_v26 = vld [vmem:[%s4296_s15 + $0xe0] sm:$0xff]  ;;  %v1727_v32 = vld [vmem:[%s4296_s15 + $0xb0] sm:$0xff] }
 0x5a8   : > { %2946 = vmatprep.subr.bf16.mxu1 %v2945_v40  ;;  %v1745_v40 = vld [vmem:[%s4296_s15 + $0x140] sm:$0xff]  ;;  %v1735_v34 = vld [vmem:[%s4296_s15 + $0xf0] sm:$0xff] }
 0x5a9   : > { %3040 = vmatpush1.bf16.msra.mxu0 %v3039_v45  ;;  %v3003_v42 = vpack.c.bf16 %v1745_v40, %v1737_v39  ;;  %v1761_v45 = vld [vmem:[%s4296_s15 + $0x1c0] sm:$0xff]  ;;  %v3095_v39 = vpack.c.bf16 %v1735_v34, %v1727_v32  ;;  %v1830_v32 = vld [vmem:[%s4296_s15 + $0x3e8] sm:$0xff]  ;;  %v1824_v34 = vld [vmem:[%s4296_s15 + $0x3b8] sm:$0xff] }
 0x5aa   : > { %3042 = vmatprep.subr.bf16.mxu0 %v3041_v46  ;;  %v1770_v46 = vld [vmem:[%s4296_s15 + $0x208] sm:$0xff]  ;;  %v3007_v48 = vpack.c.bf16 %v1761_v45, %v1753_v44  ;;  %v1741_v40 = vld [vmem:[%s4296_s15 + $0x120] sm:$0xff]  ;;  %v1751_v44 = vld [vmem:[%s4296_s15 + $0x170] sm:$0xff] }
 0x5ab   : > { %2948 = vmatpush1.bf16.msra.mxu1 %v2947_v49  ;;  %v3009_v49 = vpack.c.bf16 %v1778_v47, %v1770_v46  ;;  %v1758_v45 = vld [vmem:[%s4296_s15 + $0x1a8] sm:$0xff]  ;;  %v1760_v47 = vld [vmem:[%s4296_s15 + $0x1b8] sm:$0xff]  ;;  %v1773_v3 = vld [vmem:[%s4296_s15 + $0x220] sm:$0xff] }
 0x5ac   : > { %2950 = vmatprep.subr.bf16.mxu1 %v2949_v57  ;;  %v1786_v57 = vld [vmem:[%s4296_s15 + $0x288] sm:$0xff]  ;;  %v1781_v4 = vld [vmem:[%s4296_s15 + $0x260] sm:$0xff] }
 0x5ad   : > { %3044 = vmatpush1.bf16.msra.mxu0 %v3043_v62  ;;  %v3013_v60 = vpack.c.bf16 %v1794_v58, %v1786_v57  ;;  %v1793_v62 = vld [vmem:[%s4296_s15 + $0x2c0] sm:$0xff]  ;;  %v1766_v46 = vld [vmem:[%s4296_s15 + $0x1e8] sm:$0xff]  ;;  %v3075_v15 = vpack.c.bf16 %v1781_v4, %v1773_v3 }
 0x5ae   : > { %3046 = vmatprep.subr.bf16.mxu0 %v3045_v63  ;;  %v1802_v63 = vld [vmem:[%s4296_s15 + $0x308] sm:$0xff]  ;;  %v3015_v1 = vpack.c.bf16 %v1793_v62, %v1785_v61  ;;  %v1765_v57 = vld [vmem:[%s4296_s15 + $0x1e0] sm:$0xff]  ;;  %v3069_v58 = vpack.c.bf16 %v1766_v46, %v1758_v45 }
 0x5af   : > { %2952 = vmatpush1.bf16.msra.mxu1 %v2951_v2  ;;  %v3017_v2 = vpack.c.bf16 %v1810_v0, %v1802_v63  ;;  %v1774_v61 = vld [vmem:[%s4296_s15 + $0x228] sm:$0xff]  ;;  %v1776_v63 = vld [vmem:[%s4296_s15 + $0x238] sm:$0xff] }
 0x5b0   : > { %2954 = vmatprep.subr.bf16.mxu1 %v2953_v6  ;;  %v1818_v6 = vld [vmem:[%s4296_s15 + $0x388] sm:$0xff]  ;;  %v1784_v0 = vld [vmem:[%s4296_s15 + $0x278] sm:$0xff] }
 0x5b1   : > { %3048 = vmatpush1.bf16.msra.mxu0 %v3047_v12  ;;  %v3089_v12 = vpack.c.bf16 %v1720_v9, %v1712_v8  ;;  %v1782_v62 = vld [vmem:[%s4296_s15 + $0x268] sm:$0xff]  ;;  %v1775_v8 = vld [vmem:[%s4296_s15 + $0x230] sm:$0xff] }
 0x5b2   : > { %3050 = vmatprep.subr.bf16.mxu0 %v3049_v13  ;;  %v3021_v13 = vpack.c.bf16 %v1826_v7, %v1818_v6  ;;  %v3073_v6 = vpack.c.bf16 %v1782_v62, %v1774_v61  ;;  %v3105_v7 = vpack.c.bf16 %v1784_v0, %v1776_v63  ;;  %v1783_v9 = vld [vmem:[%s4296_s15 + $0x270] sm:$0xff] }
 0x5b3   : > { %2956 = vmatpush1.bf16.msra.mxu1 %v2955_v16  ;;  %v1710_v16 = vld [vmem:[%s4296_s15 + $0x28] sm:$0xff] }
 0x5b4   : > { %2958 = vmatprep.subr.bf16.mxu1 %v2957_v5  ;;  %v3057_v5 = vpack.c.bf16 %v1718_v17, %v1710_v16  ;;  %v3107_v16 = vpack.c.bf16 %v1783_v9, %v1775_v8  ;;  %v1789_v17 = vld [vmem:[%s4296_s15 + $0x2a0] sm:$0xff] }
 0x5b5   : > { %3052 = vmatpush1.bf16.msra.mxu0 %v3051_v54  ;;  %v1726_v54 = vld [vmem:[%s4296_s15 + $0xa8] sm:$0xff] }
 0x5b6   : > { %3054 = vmatprep.subr.bf16.mxu0 %v3053_v51  ;;  %v1734_v51 = vld [vmem:[%s4296_s15 + $0xe8] sm:$0xff] }
 0x5b7   : > { %2960 = vmatpush1.bf16.msra.mxu1 %v2959_v22 }
 0x5b8   : > { %2994 = vmatprep.subr.bf16.mxu1 %v2993_v23  ;;  %v3059_v23 = vpack.c.bf16 %v1717_v20, %v1709_v19  ;;  %v1791_v20 = vld [vmem:[%s4296_s15 + $0x2b0] sm:$0xff] }
 0x5b9   : > { %3056 = vmatpush1.bf16.msra.mxu0 %v3055_v28 }
 0x5ba   : > { %2168 = vmatmul.mubr.f32.vlgmr.msra.gmra.mrb[22].mxu1 %v3626_v33  ;;  %v1762_v33 = vld [vmem:[%s4296_s15 + $0x1c8] sm:$0xff]  ;;  %3090 = vmatprep.subr.bf16.mxu0 %v3089_v12 }
 0x5bb   : > { %2996 = vmatpush1.bf16.msra.mxu1 %v2995_v29  ;;  %2309 = vmatprep.mubr.f32.mxu1 %v3172_v31  ;;  %v3005_v43 = vpack.c.bf16 %v1762_v33, %v1754_v41  ;;  %v3061_v29 = vpack.c.bf16 %v1734_v51, %v1726_v54  ;;  %v1749_v41 = vld [vmem:[%s4296_s15 + $0x160] sm:$0xff]  ;;  %v1798_v12 = vld [vmem:[%s4296_s15 + $0x2e8] sm:$0xff]  ;;  %v1808_v51 = vld [vmem:[%s4296_s15 + $0x338] sm:$0xff] }
 0x5bc   : > { %2998 = vmatprep.subr.bf16.mxu1 %v2997_v30  ;;  %v3093_v30 = vpack.c.bf16 %v1736_v21, %v1728_v55  ;;  %v1814_v54 = vld [vmem:[%s4296_s15 + $0x368] sm:$0xff]  ;;  %v1816_v55 = vld [vmem:[%s4296_s15 + $0x378] sm:$0xff] }
 0x5bf   : > { %3000 = vmatpush1.bf16.msra.mxu1 %v2999_v37  ;;  %v1752_v37 = vld [vmem:[%s4296_s15 + $0x178] sm:$0xff] }
 0x5c0   : > { %3002 = vmatprep.subr.bf16.mxu1 %v3001_v38  ;;  %v3063_v38 = vpack.c.bf16 %v1733_v26, %v1725_v25  ;;  %v3081_v25 = vpack.c.bf16 %v1814_v54, %v1806_v53  ;;  %v3113_v26 = vpack.c.bf16 %v1816_v55, %v1808_v51 }
 0x5c3   : > { %3004 = vmatpush1.bf16.msra.mxu1 %v3003_v42  ;;  %v3097_v42 = vpack.c.bf16 %v1752_v37, %v1744_v36  ;;  %v1821_v37 = vld [vmem:[%s4296_s15 + $0x3a0] sm:$0xff] }
 0x5c4   : > { %3006 = vmatprep.subr.bf16.mxu1 %v3005_v43  ;;  %v1743_v43 = vld [vmem:[%s4296_s15 + $0x130] sm:$0xff] }
 0x5c5   : > { %v3099_v50 = vpack.c.bf16 %v1751_v44, %v1743_v43 }
 0x5c7   : > { %3008 = vmatpush1.bf16.msra.mxu1 %v3007_v48  ;;  %v1768_v48 = vld [vmem:[%s4296_s15 + $0x1f8] sm:$0xff] }
 0x5c8   : > { %3010 = vmatprep.subr.bf16.mxu1 %v3009_v49  ;;  %v3067_v49 = vpack.c.bf16 %v1749_v41, %v1741_v40  ;;  %v1829_v40 = vld [vmem:[%s4296_s15 + $0x3e0] sm:$0xff]  ;;  %v1823_v41 = vld [vmem:[%s4296_s15 + $0x3b0] sm:$0xff] }
 0x5cb   : > { %3012 = vmatpush1.bf16.msra.mxu1 %v3011_v59  ;;  %v3101_v59 = vpack.c.bf16 %v1768_v48, %v1760_v47 }
 0x5cc   : > { %3014 = vmatprep.subr.bf16.mxu1 %v3013_v60  ;;  %v1767_v60 = vld [vmem:[%s4296_s15 + $0x1f0] sm:$0xff] }
 0x5cf   : > { %3016 = vmatpush1.bf16.msra.mxu1 %v3015_v1  ;;  %v3071_v1 = vpack.c.bf16 %v1765_v57, %v1757_v56 }
 0x5d0   : > { %3018 = vmatprep.subr.bf16.mxu1 %v3017_v2 }
 0x5d3   : > { %3020 = vmatpush1.bf16.msra.mxu1 %v3019_v10  ;;  %v1790_v10 = vld [vmem:[%s4296_s15 + $0x2a8] sm:$0xff] }
 0x5d4   : > { %3022 = vmatprep.subr.bf16.mxu1 %v3021_v13  ;;  %v1792_v13 = vld [vmem:[%s4296_s15 + $0x2b8] sm:$0xff] }
 0x5d5   : > { %v3109_v19 = vpack.c.bf16 %v1800_v14, %v1792_v13 }
 0x5d7   : > { %3024 = vmatpush1.bf16.msra.mxu1 %v3023_v18  ;;  %v1797_v18 = vld [vmem:[%s4296_s15 + $0x2e0] sm:$0xff] }
 0x5d8   : > { %3058 = vmatprep.subr.bf16.mxu1 %v3057_v5  ;;  %v3077_v5 = vpack.c.bf16 %v1798_v12, %v1790_v10  ;;  %v3079_v21 = vpack.c.bf16 %v1797_v18, %v1789_v17 }
 0x64d   : > { %v1700_v22 = vpop.f32.mrb[18].mxu1 }
 0x64e   : > { %v4116_v27 = vadd.f32 %v1700_v22, %v3469_v11  ;;  %v2817_v28 = vpop.f32.mrb[19].mxu1  ;;  %v1750_v11 = vld [vmem:[%s4296_s15 + $0x168] sm:$0xff]  ;;  %v3111_v22 = vpack.c.bf16 %v1799_v52, %v1791_v20 }
 0x64f   : > { %v3065_v33 = vpack.c.bf16 %v1750_v11, %v1742_v35  ;;  %v1807_v28 = vld [vmem:[%s4296_s15 + $0x330] sm:$0xff]  ;;  %v1832_v35 = vld [vmem:[%s4296_s15 + $0x3f8] sm:$0xff] }
 0x650   : > { %2310 = vmatmul.mubr.f32.vlgmr.msra.gmra.mrb[20].mxu1 %v4116_v27  ;;  %2381 = vmatmul.mubr.f32.vlgmr.msra.gmra.mrb[10].mxu0 %v4116_v27 }
 0x651   : > { %3060 = vmatpush1.bf16.msra.mxu1 %v3059_v23  ;;  %3092 = vmatpush1.bf16.msra.mxu0 %v3091_v24  ;;  %v1805_v23 = vld [vmem:[%s4296_s15 + $0x320] sm:$0xff] }
 0x652   : > { %3062 = vmatprep.subr.bf16.mxu1 %v3061_v29  ;;  %3094 = vmatprep.subr.bf16.mxu0 %v3093_v30  ;;  %v1813_v24 = vld [vmem:[%s4296_s15 + $0x360] sm:$0xff]  ;;  %v1815_v29 = vld [vmem:[%s4296_s15 + $0x370] sm:$0xff]  ;;  %v1822_v30 = vld [vmem:[%s4296_s15 + $0x3a8] sm:$0xff] }
 0x653   : > { %2451 = vmatprep.mubr.f32.mxu1 %v3172_v31  ;;  %2522 = vmatprep.mubr.f32.mxu0 %v3172_v31  ;;  %v1759_v31 = vld [vmem:[%s4296_s15 + $0x1b0] sm:$0xff]  ;;  %v3083_v11 = vpack.c.bf16 %v1813_v24, %v1805_v23  ;;  %v3115_v36 = vpack.c.bf16 %v1815_v29, %v1807_v28 }
 0x654   : > { %v3103_v2 = vpack.c.bf16 %v1767_v60, %v1759_v31 }
 0x655   : > { %3064 = vmatpush1.bf16.msra.mxu1 %v3063_v38  ;;  %3096 = vmatpush1.bf16.msra.mxu0 %v3095_v39  ;;  %v3085_v38 = vpack.c.bf16 %v1830_v32, %v1822_v30  ;;  %v3117_v39 = vpack.c.bf16 %v1832_v35, %v1824_v34 }
 0x656   : > { %3066 = vmatprep.subr.bf16.mxu1 %v3065_v33  ;;  %3098 = vmatprep.subr.bf16.mxu0 %v3097_v42  ;;  %v1831_v33 = vld [vmem:[%s4296_s15 + $0x3f0] sm:$0xff]  ;;  %v3087_v42 = vpack.c.bf16 %v1829_v40, %v1821_v37 }
 0x657   : > { %v3119_v43 = vpack.c.bf16 %v1831_v33, %v1823_v41 }
 0x659   : > { %3068 = vmatpush1.bf16.msra.mxu1 %v3067_v49  ;;  %3100 = vmatpush1.bf16.msra.mxu0 %v3099_v50 }
 0x65a   : > { %3070 = vmatprep.subr.bf16.mxu1 %v3069_v58  ;;  %3102 = vmatprep.subr.bf16.mxu0 %v3101_v59 }
 0x65d   : > { %3072 = vmatpush1.bf16.msra.mxu1 %v3071_v1  ;;  %3104 = vmatpush1.bf16.msra.mxu0 %v3103_v2 }
 0x65e   : > { %3074 = vmatprep.subr.bf16.mxu1 %v3073_v6  ;;  %3106 = vmatprep.subr.bf16.mxu0 %v3105_v7 }
 0x661   : > { %3076 = vmatpush1.bf16.msra.mxu1 %v3075_v15  ;;  %3108 = vmatpush1.bf16.msra.mxu0 %v3107_v16 }
 0x662   : > { %3078 = vmatprep.subr.bf16.mxu1 %v3077_v5  ;;  %3110 = vmatprep.subr.bf16.mxu0 %v3109_v19 }
 0x665   : > { %3080 = vmatpush1.bf16.msra.mxu1 %v3079_v21  ;;  %3112 = vmatpush1.bf16.msra.mxu0 %v3111_v22 }
 0x666   : > { %3082 = vmatprep.subr.bf16.mxu1 %v3081_v25  ;;  %3114 = vmatprep.subr.bf16.mxu0 %v3113_v26 }
 0x669   : > { %3084 = vmatpush1.bf16.msra.mxu1 %v3083_v11  ;;  %3116 = vmatpush1.bf16.msra.mxu0 %v3115_v36 }
 0x66a   : > { %3086 = vmatprep.subr.bf16.mxu1 %v3085_v38  ;;  %3118 = vmatprep.subr.bf16.mxu0 %v3117_v39 }
 0x66d   : > { %3088 = vmatpush1.bf16.msra.mxu1 %v3087_v42  ;;  %3120 = vmatpush1.bf16.msra.mxu0 %v3119_v43 }
 0x670   : > { %2452 = vmatmul.mubr.f32.vlgmr.msra.gmra.mrb[22].mxu1 %v4116_v27  ;;  %2523 = vmatmul.mubr.f32.vlgmr.msra.gmra.mrb[12].mxu0 %v4116_v27 }
 0x723   : > { %v2311_v44 = vpop.f32.mrb[20].mxu1  ;;  %v2382_v45 = vpop.f32.mrb[10].mxu0 }
 0x724   : > { %2529 = vst [vmem:[%s568_s0] sm:$0xff] %v2311_v44  ;;  %2531 = vst [vmem:[%s568_s0 + $0x10] sm:$0xff] %v2382_v45  ;;  %v2313_v46 = vpop.f32.mrb[21].mxu1  ;;  %v2384_v47 = vpop.f32.mrb[11].mxu0 }
 0x725   : > { %2530 = vst [vmem:[%s568_s0 + $0x8] sm:$0xff] %v2313_v46  ;;  %2532 = vst [vmem:[%s568_s0 + $0x18] sm:$0xff] %v2384_v47 }
 0x743   : > { %v2453_v48 = vpop.f32.mrb[22].mxu1  ;;  %v2524_v49 = vpop.f32.mrb[12].mxu0 }
 0x744   : > { %2533 = vst [vmem:[%s568_s0 + $0x20] sm:$0xff] %v2453_v48  ;;  %2535 = vst [vmem:[%s568_s0 + $0x30] sm:$0xff] %v2524_v49  ;;  %v2455_v50 = vpop.f32.mrb[23].mxu1  ;;  %v2526_v56 = vpop.f32.mrb[13].mxu0 }
 0x745   : > { %2534 = vst [vmem:[%s568_s0 + $0x28] sm:$0xff] %v2455_v50  ;;  %2536 = vst [vmem:[%s568_s0 + $0x38] sm:$0xff] %v2526_v56 }
 0x746 PF: > { %s27_s24 = sadd.s32 1, %s3168_s24  }
 0x747   : > { %p24_p4 = scmp.ge.s32.totalorder %s27_s24, 4  }
 0x749   :  { %26 = sbr.rel (!%p24_p4) target bundleno = 3 (0x3), region = 121 }

</bundles_post_ra>
